<compile_context>
chip_gen: v6e
topology: v6e:2x2x1
jax: 0.10.0
libtpu: 0.0.40
codegen_flags: <defaults>
</compile_context>

<pallas_src>
import math
import jax
import jax.numpy as jnp
import numpy as np
from jax import lax
from jax.experimental import pallas as pl
from jax.experimental.pallas import tpu as pltpu

# ---- tiny synthetic Llama config ----
B = 2              # batch
S = 8              # sequence length
H = 32             # hidden size
NUM_HEADS = 4
HEAD_DIM = H // NUM_HEADS
HALF = HEAD_DIM // 2
INTER = 64         # intermediate (MLP) size
NUM_LAYERS = 2     # "num" in FTLlamaDecoderLayers
EPS = 1e-6         # rms_norm_eps
ROPE_THETA = 10000.0
SCALE = 1.0 / math.sqrt(HEAD_DIM)
NEG_INF = -1e30
T = B * S          # tokens per block (batch folded into the block)


# --------------------------------------------------------------------------------------
# Fused decoder-stack kernel.  Grid = (NUM_LAYERS,), "arbitrary": the (B, S, H) output
# block is revisited across layers, so the hidden state lives in VMEM for the whole
# stack and each layer's weights are fetched exactly once.
# --------------------------------------------------------------------------------------
def fused_decoder_kernel(x_ref, cos_ref, sin_ref,
                         ln1_ref, wqkv_ref, wo_ref,
                         ln2_ref, wgu_ref, wd_ref,
                         out_ref):
    l = pl.program_id(0)

    # Seed the VMEM-resident hidden state once (first layer).
    @pl.when(l == 0)
    def _():
        out_ref[...] = x_ref[...]

    # Flatten (B, S, H) -> (T, H) tokens with a sublane concat (tile-aligned, cheap;
    # avoids an in-kernel reshape touching the minor two dims).
    xs = out_ref[...]                                            # (B, S, H) f32
    x = jnp.concatenate([xs[b] for b in range(B)], axis=0)       # (T, H)

    cos = cos_ref[...]                                           # (T, Dh) f32
    sin = sin_ref[...]

    ln1 = ln1_ref[0]                                             # (1, H)  f32
    wqkv = wqkv_ref[0]                                           # (3, nH, H, Dh) bf16
    wo = wo_ref[0]                                               # (nH, Dh, H)    bf16
    ln2 = ln2_ref[0]                                             # (1, H)  f32
    wgu = wgu_ref[0]                                             # (H, 2*INTER)   bf16
    wd = wd_ref[0]                                               # (INTER, H)     bf16

    # ---------------- input RMSNorm (f32) ----------------
    var = jnp.mean(x * x, axis=-1, keepdims=True)
    h = x * lax.rsqrt(var + EPS) * ln1
    hb = h.astype(jnp.bfloat16)

    # ------- head-batched QKV projections (head split lives in the weight layout) ----
    # No lane->sublane relayout of activations anywhere; the only duplication is the
    # small lhs broadcast over the head batch dim.
    hb_h = jnp.broadcast_to(hb[None], (NUM_HEADS, T, H))         # (nH, T, H) bf16
    dn_proj = (((2,), (1,)), ((0,), (0,)))                       # bij,bjk->bik
    q = lax.dot_general(hb_h, wqkv[0], dn_proj, preferred_element_type=jnp.float32)
    k = lax.dot_general(hb_h, wqkv[1], dn_proj, preferred_element_type=jnp.float32)
    v = lax.dot_general(hb_h, wqkv[2], dn_proj, preferred_element_type=jnp.float32)
    # q, k, v: (nH, T, Dh) f32

    # -------- RoPE on the head-batched layout: one rotate-half per tensor --------
    # TODO(synk): use pltpu.roll(t, HALF, -1) * sign at production Dh=128 (lane-dense);
    # at Dh=8 the concat form lowers reliably.
    def rope(t):
        rot = jnp.concatenate([-t[..., HALF:], t[..., :HALF]], axis=-1)
        return t * cos[None] + rot * sin[None]

    q = rope(q).astype(jnp.bfloat16)
    k = rope(k).astype(jnp.bfloat16)
    v = v.astype(jnp.bfloat16)

    # ------ causal attention: head-batched dots + in-kernel iota mask (no mask input,
    # no cross-head score FLOPs).  B=2 is unrolled inside the grid step so the layer
    # weights are still fetched only once per layer.
    causal = (lax.broadcasted_iota(jnp.int32, (NUM_HEADS, S, S), 1) >=
              lax.broadcasted_iota(jnp.int32, (NUM_HEADS, S, S), 2))
    dn_qk = (((2,), (2,)), ((0,), (0,)))                         # bqd,bkd->bqk
    dn_pv = (((2,), (1,)), ((0,), (0,)))                         # bqk,bkd->bqd
    a_parts = []
    for b in range(B):
        sl = slice(b * S, (b + 1) * S)                           # tile-aligned slice
        sc = lax.dot_general(q[:, sl, :], k[:, sl, :], dn_qk,
                             preferred_element_type=jnp.float32) * SCALE   # (nH,S,S)
        sc = jnp.where(causal, sc, NEG_INF)      # every row keeps its diagonal -> no 0/0
        sc = sc - jnp.max(sc, axis=-1, keepdims=True)            # stable softmax
        p = jnp.exp(sc)
        p = p * pl.reciprocal(jnp.sum(p, axis=-1, keepdims=True), approx=True)
        a_parts.append(lax.dot_general(p.astype(jnp.bfloat16), v[:, sl, :], dn_pv,
                                       preferred_element_type=jnp.float32))
    a = jnp.concatenate(a_parts, axis=1).astype(jnp.bfloat16)    # (nH, T, Dh)

    # ------- per-head output projection + sum over heads (no head "unstack" relayout) -
    o_h = lax.dot_general(a, wo, (((2,), (1,)), ((0,), (0,))),
                          preferred_element_type=jnp.float32)    # (nH, T, H)
    hcur = x + jnp.sum(o_h, axis=0)                              # (T, H) f32

    # ---------------- post-attention RMSNorm + SwiGLU MLP ----------------
    var2 = jnp.mean(hcur * hcur, axis=-1, keepdims=True)
    h2 = (hcur * lax.rsqrt(var2 + EPS) * ln2).astype(jnp.bfloat16)
    gu = jnp.dot(h2, wgu, preferred_element_type=jnp.float32)    # (T, 2I) lane-dense N
    g = gu[:, :INTER]
    u = gu[:, INTER:]
    m = (g * jax.nn.sigmoid(g)) * u                              # SiLU(gate)*up (f32)
    m = jnp.dot(m.astype(jnp.bfloat16), wd, preferred_element_type=jnp.float32)
    y = hcur + m                                                 # (T, H)

    # Write the resident hidden state back per batch row-block (tile-aligned stores).
    for b in range(B):
        out_ref[b] = y[b * S:(b + 1) * S, :]


def fused_forward(x, cos_t, sin_t, sp):
    in_specs = [
        pl.BlockSpec((B, S, H), lambda l: (0, 0, 0)),                          # x seed
        pl.BlockSpec((T, HEAD_DIM), lambda l: (0, 0)),                         # cos
        pl.BlockSpec((T, HEAD_DIM), lambda l: (0, 0)),                         # sin
        pl.BlockSpec((1, 1, H), lambda l: (l, 0, 0)),                          # ln1
        pl.BlockSpec((1, 3, NUM_HEADS, H, HEAD_DIM),
                     lambda l: (l, 0, 0, 0, 0)),                               # wq/wk/wv
        pl.BlockSpec((1, NUM_HEADS, HEAD_DIM, H), lambda l: (l, 0, 0, 0)),     # wo
        pl.BlockSpec((1, 1, H), lambda l: (l, 0, 0)),                          # ln2
        pl.BlockSpec((1, H, 2 * INTER), lambda l: (l, 0, 0)),                  # wgu
        pl.BlockSpec((1, INTER, H), lambda l: (l, 0, 0)),                      # wd
    ]
    return pl.pallas_call(
        fused_decoder_kernel,
        out_shape=jax.ShapeDtypeStruct((B, S, H), jnp.float32),
        grid=(NUM_LAYERS,),
        in_specs=in_specs,
        out_specs=pl.BlockSpec((B, S, H), lambda l: (0, 0, 0)),
        compiler_params=pltpu.CompilerParams(
            dimension_semantics=("arbitrary",),
            vmem_limit_bytes=32 * 1024 * 1024),
    )(x, cos_t, sin_t, sp["ln1"], sp["wqkv"], sp["wo"], sp["ln2"], sp["wgu"], sp["wd"])


forward = jax.jit(fused_forward)


# ---------------------------- host-side parameter prep ----------------------------
def init_params(key):
    layers = []
    for i in range(NUM_LAYERS):
        keys = jax.random.split(jax.random.fold_in(key, i), 7)

        def w(k, shape):
            return 0.02 * jax.random.normal(k, shape, jnp.float32)

        layers.append(dict(
            ln1=jnp.ones((1, H), jnp.float32),
            wq=w(keys[0], (H, H)),
            wk=w(keys[1], (H, H)),
            wv=w(keys[2], (H, H)),
            wo=w(keys[3], (H, H)),
            ln2=jnp.ones((1, H), jnp.float32),
            wg=w(keys[4], (H, INTER)),
            wu=w(keys[5], (H, INTER)),
            wd=w(keys[6], (INTER, H)),
        ))
    return layers


def stack_layer_params(layer_params):
    # Per-head weight layout (free on the host): head h owns output columns
    # h*Dh:(h+1)*Dh of Wq/Wk/Wv and input rows h*Dh:(h+1)*Dh of Wo.
    def cols_per_head(w):   # (H, H) -> (nH, H, Dh)
        return jnp.stack(
            [w[:, hh * HEAD_DIM:(hh + 1) * HEAD_DIM] for hh in range(NUM_HEADS)], 0)

    def rows_per_head(w):   # (H, H) -> (nH, Dh, H)
        return jnp.stack(
            [w[hh * HEAD_DIM:(hh + 1) * HEAD_DIM, :] for hh in range(NUM_HEADS)], 0)

    return dict(
        ln1=jnp.stack([p["ln1"] for p in layer_params]),                        # (L,1,H)
        wqkv=jnp.stack([jnp.stack([cols_per_head(p["wq"]),
                                   cols_per_head(p["wk"]),
                                   cols_per_head(p["wv"])], 0)
                        for p in layer_params]).astype(jnp.bfloat16),   # (L,3,nH,H,Dh)
        wo=jnp.stack([rows_per_head(p["wo"])
                      for p in layer_params]).astype(jnp.bfloat16),     # (L,nH,Dh,H)
        ln2=jnp.stack([p["ln2"] for p in layer_params]),                        # (L,1,H)
        wgu=jnp.stack([jnp.concatenate([p["wg"], p["wu"]], axis=1)
                       for p in layer_params]).astype(jnp.bfloat16),            # (L,H,2I)
        wd=jnp.stack([p["wd"] for p in layer_params]).astype(jnp.bfloat16),     # (L,I,H)
    )


def rope_tables():
    pos = jnp.arange(S, dtype=jnp.float32)
    inv_freq = 1.0 / (ROPE_THETA ** (jnp.arange(0, HEAD_DIM, 2, dtype=jnp.float32)
                                     / HEAD_DIM))
    freqs = jnp.outer(pos, inv_freq)
    emb = jnp.concatenate([freqs, freqs], axis=-1)       # (S, HEAD_DIM)
    return jnp.cos(emb), jnp.sin(emb)


# ---------------------------- pure-JAX f32 reference ----------------------------
def reference_forward(x, cos, sin, layer_params):
    half = HEAD_DIM // 2

    def rope(t):  # t: (B, nH, S, Dh)
        rot = jnp.concatenate([-t[..., half:], t[..., :half]], axis=-1)
        return t * cos + rot * sin

    for p in layer_params:
        residual = x
        var = jnp.mean(x * x, axis=-1, keepdims=True)
        h = x * lax.rsqrt(var + EPS) * p["ln1"]
        q = h @ p["wq"]
        k = h @ p["wk"]
        v = h @ p["wv"]

        def split(t):
            return t.reshape(B, S, NUM_HEADS, HEAD_DIM).transpose(0, 2, 1, 3)

        q, k, v = rope(split(q)), rope(split(k)), split(v)
        s = jnp.einsum("bhqd,bhkd->bhqk", q, k) / math.sqrt(HEAD_DIM)
        mask = jnp.tril(jnp.ones((S, S), bool))
        s = jnp.where(mask, s, NEG_INF)
        a = jnp.einsum("bhqk,bhkd->bhqd", jax.nn.softmax(s, axis=-1), v)
        a = a.transpose(0, 2, 1, 3).reshape(B, S, H)
        x = residual + a @ p["wo"]

        residual = x
        var = jnp.mean(x * x, axis=-1, keepdims=True)
        h2 = x * lax.rsqrt(var + EPS) * p["ln2"]
        g = h2 @ p["wg"]
        u = h2 @ p["wu"]
        x = residual + ((g * jax.nn.sigmoid(g)) * u) @ p["wd"]
    return x


if __name__ == "__main__":
    key = jax.random.PRNGKey(0)
    kx, kp = jax.random.split(key)
    x = jax.random.normal(kx, (B, S, H), jnp.float32)
    params = init_params(kp)

    cos, sin = rope_tables()                  # (S, HEAD_DIM)
    cos_t = jnp.tile(cos, (B, 1))             # (B*S, HEAD_DIM) — tiled by B, not nH
    sin_t = jnp.tile(sin, (B, 1))
    stacked = stack_layer_params(params)

    out = jax.block_until_ready(forward(x, cos_t, sin_t, stacked))

    ref = jax.block_until_ready(reference_forward(x, cos, sin, params))
    np.testing.assert_allclose(np.asarray(out), np.asarray(ref), rtol=5e-2, atol=5e-3)

    # TODO(synk): past_key_value / use_cache / output_attentions / explicit
    # attention_mask paths are not implemented (only the causal-mask, no-cache path,
    # matching what the reference forward keeps: hidden_states only).
    print("KERNEL_OK")
</pallas_src>

<mosaic_0001>
module attributes {stable_mosaic.version = 11 : i64} {
  func.func @fused_decoder_kernel(%arg0: i32, %arg1: memref<2x8x32xf32, #tpu.memory_space<vmem>>, %arg2: memref<16x8xf32, #tpu.memory_space<vmem>>, %arg3: memref<16x8xf32, #tpu.memory_space<vmem>>, %arg4: memref<1x1x32xf32, #tpu.memory_space<vmem>>, %arg5: memref<1x3x4x32x8xbf16, #tpu.memory_space<vmem>>, %arg6: memref<1x4x8x32xbf16, #tpu.memory_space<vmem>>, %arg7: memref<1x1x32xf32, #tpu.memory_space<vmem>>, %arg8: memref<1x32x128xbf16, #tpu.memory_space<vmem>>, %arg9: memref<1x64x32xbf16, #tpu.memory_space<vmem>>, %arg10: memref<2x8x32xf32, #tpu.memory_space<vmem>>) attributes {dimension_semantics = [#tpu.dimension_semantics<arbitrary>], iteration_bounds = array<i64: 2>, scalar_prefetch = 0 : i64, scratch_operands = 0 : i64, tpu.core_type = #tpu.core_type<tc>, window_params = [{pipeline_mode = #tpu.pipeline_mode<synchronous>, transform_indices = @transform_0, window_bounds = array<i64: 2, 8, 32>}, {pipeline_mode = #tpu.pipeline_mode<synchronous>, transform_indices = @transform_1, window_bounds = array<i64: 16, 8>}, {pipeline_mode = #tpu.pipeline_mode<synchronous>, transform_indices = @transform_2, window_bounds = array<i64: 16, 8>}, {transform_indices = @transform_3, window_bounds = array<i64: 1, 1, 32>}, {transform_indices = @transform_4, window_bounds = array<i64: 1, 3, 4, 32, 8>}, {transform_indices = @transform_5, window_bounds = array<i64: 1, 4, 8, 32>}, {transform_indices = @transform_6, window_bounds = array<i64: 1, 1, 32>}, {transform_indices = @transform_7, window_bounds = array<i64: 1, 32, 128>}, {transform_indices = @transform_8, window_bounds = array<i64: 1, 64, 32>}, {pipeline_mode = #tpu.pipeline_mode<synchronous>, transform_indices = @transform_9, window_bounds = array<i64: 2, 8, 32>}]} {
    %c0_i32 = arith.constant 0 : i32
    %0 = arith.cmpi eq, %arg0, %c0_i32 : i32
    %1 = arith.extui %0 : i1 to i32
    %c0_i32_0 = arith.constant 0 : i32
    %2 = arith.cmpi ne, %1, %c0_i32_0 : i32
    scf.if %2 {
      %c0_60 = arith.constant 0 : index
      %c0_61 = arith.constant 0 : index
      %c0_62 = arith.constant 0 : index
      %157 = vector.load %arg1[%c0_60, %c0_61, %c0_62] : memref<2x8x32xf32, #tpu.memory_space<vmem>>, vector<2x8x32xf32>
      %c0_63 = arith.constant 0 : index
      %c0_64 = arith.constant 0 : index
      %c0_65 = arith.constant 0 : index
      %158 = vector.load %arg10[%c0_63, %c0_64, %c0_65] : memref<2x8x32xf32, #tpu.memory_space<vmem>>, vector<2x8x32xf32>
      tpu.vector_store %arg10[%c0_63, %c0_64, %c0_65], %157 {strides = array<i32>} : memref<2x8x32xf32, #tpu.memory_space<vmem>>, vector<2x8x32xf32>,
    } else {
    }
    %c0 = arith.constant 0 : index
    %c0_1 = arith.constant 0 : index
    %c0_2 = arith.constant 0 : index
    %3 = vector.load %arg10[%c0, %c0_1, %c0_2] : memref<2x8x32xf32, #tpu.memory_space<vmem>>, vector<2x8x32xf32>
    %4 = vector.extract_strided_slice %3 {offsets = [0, 0, 0], sizes = [1, 8, 32], strides = [1, 1, 1]} : vector<2x8x32xf32> to vector<1x8x32xf32>
    %5 = vector.shape_cast %4 : vector<1x8x32xf32> to vector<8x32xf32>
    %6 = vector.extract_strided_slice %3 {offsets = [1, 0, 0], sizes = [1, 8, 32], strides = [1, 1, 1]} : vector<2x8x32xf32> to vector<1x8x32xf32>
    %7 = vector.shape_cast %6 : vector<1x8x32xf32> to vector<8x32xf32>
    %8 = tpu.concatenate %5, %7 in 0 : vector<8x32xf32>, vector<8x32xf32> -> vector<16x32xf32>
    %c0_3 = arith.constant 0 : index
    %c0_4 = arith.constant 0 : index
    %9 = vector.load %arg2[%c0_3, %c0_4] : memref<16x8xf32, #tpu.memory_space<vmem>>, vector<16x8xf32>
    %c0_5 = arith.constant 0 : index
    %c0_6 = arith.constant 0 : index
    %10 = vector.load %arg3[%c0_5, %c0_6] : memref<16x8xf32, #tpu.memory_space<vmem>>, vector<16x8xf32>
    %c0_7 = arith.constant 0 : index
    %c0_8 = arith.constant 0 : index
    %c0_9 = arith.constant 0 : index
    %11 = vector.load %arg4[%c0_7, %c0_8, %c0_9] : memref<1x1x32xf32, #tpu.memory_space<vmem>>, vector<1x1x32xf32>
    %12 = vector.shape_cast %11 : vector<1x1x32xf32> to vector<1x32xf32>
    %c0_10 = arith.constant 0 : index
    %c0_11 = arith.constant 0 : index
    %c0_12 = arith.constant 0 : index
    %c0_13 = arith.constant 0 : index
    %c0_14 = arith.constant 0 : index
    %13 = vector.load %arg5[%c0_10, %c0_11, %c0_12, %c0_13, %c0_14] : memref<1x3x4x32x8xbf16, #tpu.memory_space<vmem>>, vector<1x3x4x32x8xbf16>
    %14 = vector.shape_cast %13 : vector<1x3x4x32x8xbf16> to vector<3x4x32x8xbf16>
    %c0_15 = arith.constant 0 : index
    %c0_16 = arith.constant 0 : index
    %c0_17 = arith.constant 0 : index
    %c0_18 = arith.constant 0 : index
    %15 = vector.load %arg6[%c0_15, %c0_16, %c0_17, %c0_18] : memref<1x4x8x32xbf16, #tpu.memory_space<vmem>>, vector<1x4x8x32xbf16>
    %16 = vector.shape_cast %15 : vector<1x4x8x32xbf16> to vector<4x8x32xbf16>
    %c0_19 = arith.constant 0 : index
    %c0_20 = arith.constant 0 : index
    %c0_21 = arith.constant 0 : index
    %17 = vector.load %arg7[%c0_19, %c0_20, %c0_21] : memref<1x1x32xf32, #tpu.memory_space<vmem>>, vector<1x1x32xf32>
    %18 = vector.shape_cast %17 : vector<1x1x32xf32> to vector<1x32xf32>
    %c0_22 = arith.constant 0 : index
    %c0_23 = arith.constant 0 : index
    %c0_24 = arith.constant 0 : index
    %19 = vector.load %arg8[%c0_22, %c0_23, %c0_24] : memref<1x32x128xbf16, #tpu.memory_space<vmem>>, vector<1x32x128xbf16>
    %20 = vector.shape_cast %19 : vector<1x32x128xbf16> to vector<32x128xbf16>
    %c0_25 = arith.constant 0 : index
    %c0_26 = arith.constant 0 : index
    %c0_27 = arith.constant 0 : index
    %21 = vector.load %arg9[%c0_25, %c0_26, %c0_27] : memref<1x64x32xbf16, #tpu.memory_space<vmem>>, vector<1x64x32xbf16>
    %22 = vector.shape_cast %21 : vector<1x64x32xbf16> to vector<64x32xbf16>
    %23 = arith.mulf %8, %8 : vector<16x32xf32>
    %cst = arith.constant dense<0.000000e+00> : vector<16xf32>
    %24 = vector.multi_reduction <add>, %23, %cst [1] : vector<16x32xf32> to vector<16xf32>
    %25 = vector.shape_cast %24 : vector<16xf32> to vector<16x1xf32>
    %cst_28 = arith.constant 3.200000e+01 : f32
    %26 = vector.broadcast %cst_28 : f32 to vector<16x1xf32>
    %27 = arith.divf %25, %26 : vector<16x1xf32>
    %cst_29 = arith.constant 9.99999997E-7 : f32
    %28 = vector.broadcast %cst_29 : f32 to vector<16x1xf32>
    %29 = arith.addf %27, %28 : vector<16x1xf32>
    %30 = math.rsqrt %29 : vector<16x1xf32>
    %31 = vector.broadcast %30 : vector<16x1xf32> to vector<16x32xf32>
    %32 = arith.mulf %8, %31 : vector<16x32xf32>
    %33 = vector.broadcast %12 : vector<1x32xf32> to vector<16x32xf32>
    %34 = arith.mulf %32, %33 : vector<16x32xf32>
    %35 = arith.truncf %34 : vector<16x32xf32> to vector<16x32xbf16>
    %36 = vector.shape_cast %35 : vector<16x32xbf16> to vector<1x16x32xbf16>
    %37 = vector.shape_cast %36 : vector<1x16x32xbf16> to vector<1x16x32xbf16>
    %38 = vector.broadcast %37 : vector<1x16x32xbf16> to vector<4x16x32xbf16>
    %39 = vector.extract_strided_slice %14 {offsets = [0, 0, 0, 0], sizes = [1, 4, 32, 8], strides = [1, 1, 1, 1]} : vector<3x4x32x8xbf16> to vector<1x4x32x8xbf16>
    %40 = vector.shape_cast %39 : vector<1x4x32x8xbf16> to vector<4x32x8xbf16>
    %cst_30 = arith.constant dense<0.000000e+00> : vector<4x16x8xf32>
    %41 = tpu.matmul %38, %40, %cst_30 {dimension_numbers = #tpu.dot_dimension_numbers<[2], [1], [1], [2], [0, 0, 0, 1, 1, 2], [0], [0]>} : vector<4x16x32xbf16>, vector<4x32x8xbf16>, vector<4x16x8xf32> -> vector<4x16x8xf32>
    %42 = vector.extract_strided_slice %14 {offsets = [1, 0, 0, 0], sizes = [1, 4, 32, 8], strides = [1, 1, 1, 1]} : vector<3x4x32x8xbf16> to vector<1x4x32x8xbf16>
    %43 = vector.shape_cast %42 : vector<1x4x32x8xbf16> to vector<4x32x8xbf16>
    %cst_31 = arith.constant dense<0.000000e+00> : vector<4x16x8xf32>
    %44 = tpu.matmul %38, %43, %cst_31 {dimension_numbers = #tpu.dot_dimension_numbers<[2], [1], [1], [2], [0, 0, 0, 1, 1, 2], [0], [0]>} : vector<4x16x32xbf16>, vector<4x32x8xbf16>, vector<4x16x8xf32> -> vector<4x16x8xf32>
    %45 = vector.extract_strided_slice %14 {offsets = [2, 0, 0, 0], sizes = [1, 4, 32, 8], strides = [1, 1, 1, 1]} : vector<3x4x32x8xbf16> to vector<1x4x32x8xbf16>
    %46 = vector.shape_cast %45 : vector<1x4x32x8xbf16> to vector<4x32x8xbf16>
    %cst_32 = arith.constant dense<0.000000e+00> : vector<4x16x8xf32>
    %47 = tpu.matmul %38, %46, %cst_32 {dimension_numbers = #tpu.dot_dimension_numbers<[2], [1], [1], [2], [0, 0, 0, 1, 1, 2], [0], [0]>} : vector<4x16x32xbf16>, vector<4x32x8xbf16>, vector<4x16x8xf32> -> vector<4x16x8xf32>
    %48 = vector.extract_strided_slice %41 {offsets = [0, 0, 4], sizes = [4, 16, 4], strides = [1, 1, 1]} : vector<4x16x8xf32> to vector<4x16x4xf32>
    %cst_33 = arith.constant 0.000000e+00 : f32
    %49 = vector.broadcast %cst_33 : f32 to vector<4x16x4xf32>
    %50 = arith.subf %49, %48 : vector<4x16x4xf32>
    %51 = vector.extract_strided_slice %41 {offsets = [0, 0, 0], sizes = [4, 16, 4], strides = [1, 1, 1]} : vector<4x16x8xf32> to vector<4x16x4xf32>
    %52 = tpu.concatenate %50, %51 in 2 : vector<4x16x4xf32>, vector<4x16x4xf32> -> vector<4x16x8xf32>
    %53 = vector.shape_cast %9 : vector<16x8xf32> to vector<1x16x8xf32>
    %54 = vector.broadcast %53 : vector<1x16x8xf32> to vector<4x16x8xf32>
    %55 = arith.mulf %41, %54 : vector<4x16x8xf32>
    %56 = vector.shape_cast %10 : vector<16x8xf32> to vector<1x16x8xf32>
    %57 = vector.broadcast %56 : vector<1x16x8xf32> to vector<4x16x8xf32>
    %58 = arith.mulf %52, %57 : vector<4x16x8xf32>
    %59 = arith.addf %55, %58 : vector<4x16x8xf32>
    %60 = arith.truncf %59 : vector<4x16x8xf32> to vector<4x16x8xbf16>
    %61 = vector.extract_strided_slice %44 {offsets = [0, 0, 4], sizes = [4, 16, 4], strides = [1, 1, 1]} : vector<4x16x8xf32> to vector<4x16x4xf32>
    %cst_34 = arith.constant 0.000000e+00 : f32
    %62 = vector.broadcast %cst_34 : f32 to vector<4x16x4xf32>
    %63 = arith.subf %62, %61 : vector<4x16x4xf32>
    %64 = vector.extract_strided_slice %44 {offsets = [0, 0, 0], sizes = [4, 16, 4], strides = [1, 1, 1]} : vector<4x16x8xf32> to vector<4x16x4xf32>
    %65 = tpu.concatenate %63, %64 in 2 : vector<4x16x4xf32>, vector<4x16x4xf32> -> vector<4x16x8xf32>
    %66 = vector.shape_cast %9 : vector<16x8xf32> to vector<1x16x8xf32>
    %67 = vector.broadcast %66 : vector<1x16x8xf32> to vector<4x16x8xf32>
    %68 = arith.mulf %44, %67 : vector<4x16x8xf32>
    %69 = vector.shape_cast %10 : vector<16x8xf32> to vector<1x16x8xf32>
    %70 = vector.broadcast %69 : vector<1x16x8xf32> to vector<4x16x8xf32>
    %71 = arith.mulf %65, %70 : vector<4x16x8xf32>
    %72 = arith.addf %68, %71 : vector<4x16x8xf32>
    %73 = arith.truncf %72 : vector<4x16x8xf32> to vector<4x16x8xbf16>
    %74 = arith.truncf %47 : vector<4x16x8xf32> to vector<4x16x8xbf16>
    %75 = tpu.iota {dimensions = array<i32: 1>} : vector<4x8x8xi32>
    %76 = tpu.iota {dimensions = array<i32: 2>} : vector<4x8x8xi32>
    %77 = arith.cmpi sge, %75, %76 : vector<4x8x8xi32>
    %78 = vector.extract_strided_slice %60 {offsets = [0, 0, 0], sizes = [4, 8, 8], strides = [1, 1, 1]} : vector<4x16x8xbf16> to vector<4x8x8xbf16>
    %79 = vector.extract_strided_slice %73 {offsets = [0, 0, 0], sizes = [4, 8, 8], strides = [1, 1, 1]} : vector<4x16x8xbf16> to vector<4x8x8xbf16>
    %cst_35 = arith.constant dense<0.000000e+00> : vector<4x8x8xf32>
    %80 = tpu.matmul %78, %79, %cst_35 {dimension_numbers = #tpu.dot_dimension_numbers<[2], [2], [1], [1], [0, 0, 0, 1, 1, 1], [0], [0]>} : vector<4x8x8xbf16>, vector<4x8x8xbf16>, vector<4x8x8xf32> -> vector<4x8x8xf32>
    %cst_36 = arith.constant 0.353553385 : f32
    %81 = vector.broadcast %cst_36 : f32 to vector<4x8x8xf32>
    %82 = arith.mulf %80, %81 : vector<4x8x8xf32>
    %cst_37 = arith.constant -1.000000e+30 : f32
    %83 = vector.broadcast %cst_37 : f32 to vector<4x8x8xf32>
    %84 = arith.select %77, %82, %83 : vector<4x8x8xi1>, vector<4x8x8xf32>
    %cst_38 = arith.constant dense<0xFF800000> : vector<4x8xf32>
    %85 = vector.multi_reduction <maximumf>, %84, %cst_38 [2] : vector<4x8x8xf32> to vector<4x8xf32>
    %86 = vector.shape_cast %85 : vector<4x8xf32> to vector<4x8x1xf32>
    %87 = vector.broadcast %86 : vector<4x8x1xf32> to vector<4x8x8xf32>
    %88 = arith.subf %84, %87 : vector<4x8x8xf32>
    %89 = math.exp %88 : vector<4x8x8xf32>
    %cst_39 = arith.constant dense<0.000000e+00> : vector<4x8xf32>
    %90 = vector.multi_reduction <add>, %89, %cst_39 [2] : vector<4x8x8xf32> to vector<4x8xf32>
    %91 = vector.shape_cast %90 : vector<4x8xf32> to vector<4x8x1xf32>
    %92 = tpu.reciprocal %91 {approx = true} : vector<4x8x1xf32> -> vector<4x8x1xf32>
    %93 = vector.broadcast %92 : vector<4x8x1xf32> to vector<4x8x8xf32>
    %94 = arith.mulf %89, %93 : vector<4x8x8xf32>
    %95 = arith.truncf %94 : vector<4x8x8xf32> to vector<4x8x8xbf16>
    %96 = vector.extract_strided_slice %74 {offsets = [0, 0, 0], sizes = [4, 8, 8], strides = [1, 1, 1]} : vector<4x16x8xbf16> to vector<4x8x8xbf16>
    %cst_40 = arith.constant dense<0.000000e+00> : vector<4x8x8xf32>
    %97 = tpu.matmul %95, %96, %cst_40 {dimension_numbers = #tpu.dot_dimension_numbers<[2], [1], [1], [2], [0, 0, 0, 1, 1, 2], [0], [0]>} : vector<4x8x8xbf16>, vector<4x8x8xbf16>, vector<4x8x8xf32> -> vector<4x8x8xf32>
    %98 = vector.extract_strided_slice %60 {offsets = [0, 8, 0], sizes = [4, 8, 8], strides = [1, 1, 1]} : vector<4x16x8xbf16> to vector<4x8x8xbf16>
    %99 = vector.extract_strided_slice %73 {offsets = [0, 8, 0], sizes = [4, 8, 8], strides = [1, 1, 1]} : vector<4x16x8xbf16> to vector<4x8x8xbf16>
    %cst_41 = arith.constant dense<0.000000e+00> : vector<4x8x8xf32>
    %100 = tpu.matmul %98, %99, %cst_41 {dimension_numbers = #tpu.dot_dimension_numbers<[2], [2], [1], [1], [0, 0, 0, 1, 1, 1], [0], [0]>} : vector<4x8x8xbf16>, vector<4x8x8xbf16>, vector<4x8x8xf32> -> vector<4x8x8xf32>
    %cst_42 = arith.constant 0.353553385 : f32
    %101 = vector.broadcast %cst_42 : f32 to vector<4x8x8xf32>
    %102 = arith.mulf %100, %101 : vector<4x8x8xf32>
    %cst_43 = arith.constant -1.000000e+30 : f32
    %103 = vector.broadcast %cst_43 : f32 to vector<4x8x8xf32>
    %104 = arith.select %77, %102, %103 : vector<4x8x8xi1>, vector<4x8x8xf32>
    %cst_44 = arith.constant dense<0xFF800000> : vector<4x8xf32>
    %105 = vector.multi_reduction <maximumf>, %104, %cst_44 [2] : vector<4x8x8xf32> to vector<4x8xf32>
    %106 = vector.shape_cast %105 : vector<4x8xf32> to vector<4x8x1xf32>
    %107 = vector.broadcast %106 : vector<4x8x1xf32> to vector<4x8x8xf32>
    %108 = arith.subf %104, %107 : vector<4x8x8xf32>
    %109 = math.exp %108 : vector<4x8x8xf32>
    %cst_45 = arith.constant dense<0.000000e+00> : vector<4x8xf32>
    %110 = vector.multi_reduction <add>, %109, %cst_45 [2] : vector<4x8x8xf32> to vector<4x8xf32>
    %111 = vector.shape_cast %110 : vector<4x8xf32> to vector<4x8x1xf32>
    %112 = tpu.reciprocal %111 {approx = true} : vector<4x8x1xf32> -> vector<4x8x1xf32>
    %113 = vector.broadcast %112 : vector<4x8x1xf32> to vector<4x8x8xf32>
    %114 = arith.mulf %109, %113 : vector<4x8x8xf32>
    %115 = arith.truncf %114 : vector<4x8x8xf32> to vector<4x8x8xbf16>
    %116 = vector.extract_strided_slice %74 {offsets = [0, 8, 0], sizes = [4, 8, 8], strides = [1, 1, 1]} : vector<4x16x8xbf16> to vector<4x8x8xbf16>
    %cst_46 = arith.constant dense<0.000000e+00> : vector<4x8x8xf32>
    %117 = tpu.matmul %115, %116, %cst_46 {dimension_numbers = #tpu.dot_dimension_numbers<[2], [1], [1], [2], [0, 0, 0, 1, 1, 2], [0], [0]>} : vector<4x8x8xbf16>, vector<4x8x8xbf16>, vector<4x8x8xf32> -> vector<4x8x8xf32>
    %118 = tpu.concatenate %97, %117 in 1 : vector<4x8x8xf32>, vector<4x8x8xf32> -> vector<4x16x8xf32>
    %119 = arith.truncf %118 : vector<4x16x8xf32> to vector<4x16x8xbf16>
    %cst_47 = arith.constant dense<0.000000e+00> : vector<4x16x32xf32>
    %120 = tpu.matmul %119, %16, %cst_47 {dimension_numbers = #tpu.dot_dimension_numbers<[2], [1], [1], [2], [0, 0, 0, 1, 1, 2], [0], [0]>} : vector<4x16x8xbf16>, vector<4x8x32xbf16>, vector<4x16x32xf32> -> vector<4x16x32xf32>
    %cst_48 = arith.constant dense<0.000000e+00> : vector<16x32xf32>
    %121 = vector.multi_reduction <add>, %120, %cst_48 [0] : vector<4x16x32xf32> to vector<16x32xf32>
    %122 = arith.addf %8, %121 : vector<16x32xf32>
    %123 = arith.mulf %122, %122 : vector<16x32xf32>
    %cst_49 = arith.constant dense<0.000000e+00> : vector<16xf32>
    %124 = vector.multi_reduction <add>, %123, %cst_49 [1] : vector<16x32xf32> to vector<16xf32>
    %125 = vector.shape_cast %124 : vector<16xf32> to vector<16x1xf32>
    %cst_50 = arith.constant 3.200000e+01 : f32
    %126 = vector.broadcast %cst_50 : f32 to vector<16x1xf32>
    %127 = arith.divf %125, %126 : vector<16x1xf32>
    %cst_51 = arith.constant 9.99999997E-7 : f32
    %128 = vector.broadcast %cst_51 : f32 to vector<16x1xf32>
    %129 = arith.addf %127, %128 : vector<16x1xf32>
    %130 = math.rsqrt %129 : vector<16x1xf32>
    %131 = vector.broadcast %130 : vector<16x1xf32> to vector<16x32xf32>
    %132 = arith.mulf %122, %131 : vector<16x32xf32>
    %133 = vector.broadcast %18 : vector<1x32xf32> to vector<16x32xf32>
    %134 = arith.mulf %132, %133 : vector<16x32xf32>
    %135 = arith.truncf %134 : vector<16x32xf32> to vector<16x32xbf16>
    %cst_52 = arith.constant dense<0.000000e+00> : vector<16x128xf32>
    %136 = tpu.matmul %135, %20, %cst_52 {dimension_numbers = #tpu.dot_dimension_numbers<[1], [0], [0], [1], [0, 0, 1, 1], [], []>} : vector<16x32xbf16>, vector<32x128xbf16>, vector<16x128xf32> -> vector<16x128xf32>
    %137 = vector.extract_strided_slice %136 {offsets = [0, 0], sizes = [16, 64], strides = [1, 1]} : vector<16x128xf32> to vector<16x64xf32>
    %138 = vector.extract_strided_slice %136 {offsets = [0, 64], sizes = [16, 64], strides = [1, 1]} : vector<16x128xf32> to vector<16x64xf32>
    %139 = arith.negf %137 : vector<16x64xf32>
    %140 = math.exp %139 : vector<16x64xf32>
    %cst_53 = arith.constant 1.000000e+00 : f32
    %141 = vector.broadcast %cst_53 : f32 to vector<16x64xf32>
    %142 = arith.addf %141, %140 : vector<16x64xf32>
    %143 = arith.divf %141, %142 : vector<16x64xf32>
    %144 = arith.mulf %137, %143 : vector<16x64xf32>
    %145 = arith.mulf %144, %138 : vector<16x64xf32>
    %146 = arith.truncf %145 : vector<16x64xf32> to vector<16x64xbf16>
    %cst_54 = arith.constant dense<0.000000e+00> : vector<16x32xf32>
    %147 = tpu.matmul %146, %22, %cst_54 {dimension_numbers = #tpu.dot_dimension_numbers<[1], [0], [0], [1], [0, 0, 1, 1], [], []>} : vector<16x64xbf16>, vector<64x32xbf16>, vector<16x32xf32> -> vector<16x32xf32>
    %148 = arith.addf %122, %147 : vector<16x32xf32>
    %149 = vector.extract_strided_slice %148 {offsets = [0, 0], sizes = [8, 32], strides = [1, 1]} : vector<16x32xf32> to vector<8x32xf32>
    %c0_55 = arith.constant 0 : index
    %c0_56 = arith.constant 0 : index
    %c0_57 = arith.constant 0 : index
    %150 = vector.load %arg10[%c0_55, %c0_56, %c0_57] : memref<2x8x32xf32, #tpu.memory_space<vmem>>, vector<1x8x32xf32>
    %151 = vector.shape_cast %150 : vector<1x8x32xf32> to vector<8x32xf32>
    %152 = vector.shape_cast %149 : vector<8x32xf32> to vector<1x8x32xf32>
    tpu.vector_store %arg10[%c0_55, %c0_56, %c0_57], %152 {strides = array<i32>} : memref<2x8x32xf32, #tpu.memory_space<vmem>>, vector<1x8x32xf32>,
    %153 = vector.extract_strided_slice %148 {offsets = [8, 0], sizes = [8, 32], strides = [1, 1]} : vector<16x32xf32> to vector<8x32xf32>
    %c1 = arith.constant 1 : index
    %c0_58 = arith.constant 0 : index
    %c0_59 = arith.constant 0 : index
    %154 = vector.load %arg10[%c1, %c0_58, %c0_59] : memref<2x8x32xf32, #tpu.memory_space<vmem>>, vector<1x8x32xf32>
    %155 = vector.shape_cast %154 : vector<1x8x32xf32> to vector<8x32xf32>
    %156 = vector.shape_cast %153 : vector<8x32xf32> to vector<1x8x32xf32>
    tpu.vector_store %arg10[%c1, %c0_58, %c0_59], %156 {strides = array<i32>} : memref<2x8x32xf32, #tpu.memory_space<vmem>>, vector<1x8x32xf32>,
    return
  }
  func.func @transform_0(%arg0: i32) -> (i32, i32, i32) {
    %c0_i32 = arith.constant 0 : i32
    %c0_i32_0 = arith.constant 0 : i32
    %c0_i32_1 = arith.constant 0 : i32
    %c0_i32_2 = arith.constant 0 : i32
    return %c0_i32, %c0_i32_0, %c0_i32_1 : i32, i32, i32
  }
  func.func @transform_1(%arg0: i32) -> (i32, i32) {
    %c0_i32 = arith.constant 0 : i32
    %c0_i32_0 = arith.constant 0 : i32
    %c0_i32_1 = arith.constant 0 : i32
    return %c0_i32, %c0_i32_0 : i32, i32
  }
  func.func @transform_2(%arg0: i32) -> (i32, i32) {
    %c0_i32 = arith.constant 0 : i32
    %c0_i32_0 = arith.constant 0 : i32
    %c0_i32_1 = arith.constant 0 : i32
    return %c0_i32, %c0_i32_0 : i32, i32
  }
  func.func @transform_3(%arg0: i32) -> (i32, i32, i32) {
    %c0_i32 = arith.constant 0 : i32
    %c0_i32_0 = arith.constant 0 : i32
    %c0_i32_1 = arith.constant 0 : i32
    return %arg0, %c0_i32, %c0_i32_0 : i32, i32, i32
  }
  func.func @transform_4(%arg0: i32) -> (i32, i32, i32, i32, i32) {
    %c0_i32 = arith.constant 0 : i32
    %c0_i32_0 = arith.constant 0 : i32
    %c0_i32_1 = arith.constant 0 : i32
    %c0_i32_2 = arith.constant 0 : i32
    %c0_i32_3 = arith.constant 0 : i32
    return %arg0, %c0_i32, %c0_i32_0, %c0_i32_1, %c0_i32_2 : i32, i32, i32, i32, i32
  }
  func.func @transform_5(%arg0: i32) -> (i32, i32, i32, i32) {
    %c0_i32 = arith.constant 0 : i32
    %c0_i32_0 = arith.constant 0 : i32
    %c0_i32_1 = arith.constant 0 : i32
    %c0_i32_2 = arith.constant 0 : i32
    return %arg0, %c0_i32, %c0_i32_0, %c0_i32_1 : i32, i32, i32, i32
  }
  func.func @transform_6(%arg0: i32) -> (i32, i32, i32) {
    %c0_i32 = arith.constant 0 : i32
    %c0_i32_0 = arith.constant 0 : i32
    %c0_i32_1 = arith.constant 0 : i32
    return %arg0, %c0_i32, %c0_i32_0 : i32, i32, i32
  }
  func.func @transform_7(%arg0: i32) -> (i32, i32, i32) {
    %c0_i32 = arith.constant 0 : i32
    %c0_i32_0 = arith.constant 0 : i32
    %c0_i32_1 = arith.constant 0 : i32
    return %arg0, %c0_i32, %c0_i32_0 : i32, i32, i32
  }
  func.func @transform_8(%arg0: i32) -> (i32, i32, i32) {
    %c0_i32 = arith.constant 0 : i32
    %c0_i32_0 = arith.constant 0 : i32
    %c0_i32_1 = arith.constant 0 : i32
    return %arg0, %c0_i32, %c0_i32_0 : i32, i32, i32
  }
  func.func @transform_9(%arg0: i32) -> (i32, i32, i32) {
    %c0_i32 = arith.constant 0 : i32
    %c0_i32_0 = arith.constant 0 : i32
    %c0_i32_1 = arith.constant 0 : i32
    %c0_i32_2 = arith.constant 0 : i32
    return %c0_i32, %c0_i32_0, %c0_i32_1 : i32, i32, i32
  }
}

</mosaic_0001>

<bundles_post_ra>
// kernel: fused_forward.1
= control target key start
LH: loop header
LB: loop body
LE: loop exit
PB: predicated region body
PF: predicated region fallthrough
CT: control target
= control target key end

     0   :  { %14 = vsyncpa [#allocation3], 0  ;;  %s3349_s30 = smov 0   ;;  %s3947_s0 = inlined_call_operand.vmem [shape: f32[2,8,32], index: 0, kind: input, shape index: {}]   ;;  %s3948_s1 = inlined_call_operand.vmem [shape: f32[16,8], index: 1, kind: input, shape index: {}]   ;;  %s3949_s2 = inlined_call_operand.vmem [shape: f32[16,8], index: 2, kind: input, shape index: {}]   ;;  %s3950_s3 = inlined_call_operand.vmem [shape: f32[2,1,32], index: 3, kind: input, shape index: {}]   ;;  %s3951_s4 = inlined_call_operand.vmem [shape: bf16[2,3,4,32,8], index: 4, kind: input, shape index: {}]   ;;  %s3952_s5 = inlined_call_operand.vmem [shape: bf16[2,4,8,32], index: 5, kind: input, shape index: {}]   ;;  %s3953_s6 = inlined_call_operand.vmem [shape: f32[2,1,32], index: 6, kind: input, shape index: {}]   ;;  %s3954_s7 = inlined_call_operand.vmem [shape: bf16[2,32,128], index: 7, kind: input, shape index: {}]   ;;  %s3955_s8 = inlined_call_operand.vmem [shape: bf16[2,64,32], index: 8, kind: input, shape index: {}]   ;;  %s3956_s9 = inlined_call_operand.hbm [shape: f32[2,8,32], index: 9, kind: output, shape index: {}]  }
   0x1 LB: > { %s3355_s10 = sadd.s32 4294967295, %s3289_s30   ;;  %p2748_p0 = scmp.ge.s32.totalorder %s3289_s30, 1  ;;  %s3289_s30 = sphi %s3349_s30, %s20_s30  }
   0x2   : > { %p329_p1 = scmp.lt.s32.totalorder %s3289_s30, 3 }
   0x4   : > { %p330_p2 = pnand %p2748_p0, %p329_p1 }
   0x5   : > { %p381_p3 = scmp.lt.s32.totalorder (!%p330_p2), %s3355_s10, 1  ;;  %p2756_p4 = scmp.ne.s32.totalorder (!%p330_p2), %s3355_s10, 0 }
   0x6   : > { %333 = sbr.rel (%p330_p2) target bundleno = 2706 (0xa92), region = 56 }
   0xb   : > { %s3361_s11 = scalar_select %p381_p3, %s3355_s10, 1 }
   0xd   : > { %s383_s14 = scalar_lea.vmem %s3950_s3, %s3361_s11  ;;  %s3152_s15 = smul.u32 192, %s3361_s11 }
   0xe   : > { %s2829_s16 = sshll.u32 %s3361_s11, 4  ;;  %s396_s19 = scalar_lea.vmem %s3953_s6, %s3361_s11 }
   0xf   : > { %s3376_s22 = scalar_lea.vmem %s3951_s4, %s3152_s15  ;;  %s3381_s25 = scalar_lea.vmem %s3952_s5, %s2829_s16 }
  0x10   : > { %s3386_s28 = scalar_lea.vmem %s3954_s7, %s2829_s16  ;;  %s2831_s29 = sshll.u32 %s3361_s11, 5 }
  0x11   : > { %s3392_s17 = scalar_lea.vmem %s3955_s8, %s2831_s29  ;;  %411 = sbr.rel (%p2756_p4) target bundleno = 24 (0x18), region = 60 }
  0x16   : > { %v412_v0 = vld [vmem:[%s3947_s0] sm:$0xff]  ;;  %vm414_vm0 = vcmask 261120   ;;  %v413_v1 = vld [vmem:[%s3947_s0 + $0x8] sm:$0xff] }
  0x17   : > { %415 = vst.msk [vmem:[#allocation2] sm:$0xff] %vm414_vm0, %v412_v0  ;;  %416 = vst.msk [vmem:[#allocation2 + $0x8] sm:$0xff] %vm414_vm0, %v413_v1 }
  0x18 PF: > { %vm491_vm1 = vcmask 261120   ;;  %v3175_v8 = vld [vmem:[%s3376_s22 + $0x8] sm:$0xff]   ;;  %v3176_v9 = vld [vmem:[%s3376_s22 + $0x18] sm:$0xff]   ;;  %v3291_v10 = vmov 0.0   ;;  %v3177_v11 = vld [vmem:[%s3376_s22] sm:$0xff]   ;;  %vm3292_vm2 = vmmov 0  }
  0x19   : > { %2916 = vmatprep.subr.bf16.mxu0 %v3291_v10  ;;  %2924 = vmatprep.subr.bf16.mxu1 %v3291_v10  ;;  %v3178_v12 = vld [vmem:[%s3376_s22 + $0x10] sm:$0xff]   ;;  %v2757_v22 = vld [vmem:[%s383_s14] ss:$0 sm:$0xff]  ;;  %v3179_v26 = vld [vmem:[%s3376_s22 + $0x28] sm:$0xff]   ;;  %s3293_s14 = smov 4   ;;  %vm1227_vm3 = vcmask 31744  }
  0x1a   : > { %2917 = vmatpush3.bf16.msra.mxu0 %v3175_v8  ;;  %2925 = vmatpush3.bf16.msra.mxu1 %v3176_v9  ;;  %v3180_v27 = vld [vmem:[%s3376_s22 + $0x38] sm:$0xff]   ;;  %v3181_v29 = vld [vmem:[%s3376_s22 + $0x20] sm:$0xff]   ;;  %v3182_v30 = vld [vmem:[%s3376_s22 + $0x30] sm:$0xff]   ;;  %vm1381_vm4 = vcmask 64512   ;;  %vm1625_vm5 = vcmask 1043456   ;;  %s3295_s11 = smov 64  }
  0x1b   : > { %2918 = vmatprep.subr.bf16.mxu0 %v3291_v10  ;;  %2926 = vmatprep.subr.bf16.mxu1 %v3291_v10  ;;  %v3183_v31 = vld [vmem:[%s3376_s22 + $0x48] sm:$0xff]   ;;  %v3184_v32 = vld [vmem:[%s3376_s22 + $0x58] sm:$0xff]   ;;  %v3185_v33 = vld [vmem:[%s3376_s22 + $0x40] sm:$0xff]   ;;  %vm2593_vm7 = vcmask 523264   ;;  %p3157_p5 = scmp.eq.s32.totalorder %s3355_s10, 1 }
  0x1c   : > { %2920 = vmatprep.mubr.msk.bf16.mxu0 %vm3292_vm2, %v3291_v10  ;;  %2928 = vmatprep.mubr.msk.bf16.mxu1 %vm3292_vm2, %v3291_v10  ;;  %v3186_v34 = vld [vmem:[%s3376_s22 + $0x50] sm:$0xff]   ;;  %v3187_v35 = vld [vmem:[%s3376_s22 + $0x68] sm:$0xff]   ;;  %v3188_v36 = vld [vmem:[%s3376_s22 + $0x78] sm:$0xff]  }
  0x1d   : > { %v3189_v37 = vld [vmem:[%s3376_s22 + $0x60] sm:$0xff]   ;;  %v3190_v38 = vld [vmem:[%s3376_s22 + $0x70] sm:$0xff]   ;;  %v3191_v39 = vld [vmem:[%s3376_s22 + $0x88] sm:$0xff]  }
  0x1e   : > { %v417_v2 = vld [vmem:[#allocation2] sm:$0xff]  ;;  %v418_v3 = vld [vmem:[#allocation2 + $0x8] sm:$0xff]  ;;  %2919 = vmatpush3.bf16.msra.mxu0 %v3177_v11  ;;  %2927 = vmatpush3.bf16.msra.mxu1 %v3178_v12  ;;  %v3192_v40 = vld [vmem:[%s3376_s22 + $0x98] sm:$0xff]  }
  0x1f   : > { %v489_v4 = vmul.f32 %v417_v2, %v417_v2  ;;  %v490_v5 = vmul.f32 %v418_v3, %v418_v3  ;;  %2932 = vmatprep.subr.bf16.mxu0 %v3291_v10  ;;  %2940 = vmatprep.subr.bf16.mxu1 %v3291_v10  ;;  %v3193_v41 = vld [vmem:[%s3376_s22 + $0x80] sm:$0xff]   ;;  %v3194_v42 = vld [vmem:[%s3376_s22 + $0x90] sm:$0xff]   ;;  %v3195_v43 = vld [vmem:[%s3376_s22 + $0xa8] sm:$0xff]  }
  0x20   : > { %v3196_v44 = vld [vmem:[%s3376_s22 + $0xb8] sm:$0xff]   ;;  %v3197_v45 = vld [vmem:[%s3376_s22 + $0xa0] sm:$0xff]   ;;  %v3198_v46 = vld [vmem:[%s3376_s22 + $0xb0] sm:$0xff]   ;;  %s3294_s22 = smov 124  }
  0x21   : > { %v492_v6 = vsel %vm491_vm1, %v489_v4, 0.0  ;;  %v495_v7 = vsel %vm491_vm1, %v490_v5, 0.0 }
  0x22   : > { %493 = vadd.xlane.f32.xlu0 %v492_v6 }
  0x26   : > { %496 = vadd.xlane.f32.xlu0 %v495_v7 }
  0xab   : > { %v494_v13 = vpop.xlane.xlu0 %493 }
  0xac   : > { %v499_v14 = vmul.f32 0.03125, %v494_v13 }
  0xae   : > { %v501_v15 = vadd.f32 1e-06, %v499_v14 }
  0xaf   : > { %v497_v16 = vpop.xlane.xlu0 %496 }
  0xb0   : > { %3205 = vrsqrt.f32 %v501_v15  ;;  %v500_v17 = vmul.f32 0.03125, %v497_v16 }
  0xb2   : > { %v502_v18 = vadd.f32 1e-06, %v500_v17 }
  0xb4   : > { %3207 = vrsqrt.f32 %v502_v18 }
  0xbd   : > { %v3206_v19 = vpop.eup %3205 }
  0xbe   : > { %v505_v20 = vmul.f32 %v3206_v19, %v417_v2 }
  0xc0   : > { %v513_v24 = vmul.f32 %v2757_v22, %v505_v20 }
  0xc1   : > { %v3208_v21 = vpop.eup %3207 }
  0xc2   : > { %v506_v23 = vmul.f32 %v3208_v21, %v418_v3 }
  0xc4   : > { %v514_v25 = vmul.f32 %v2757_v22, %v506_v23 }
  0xc6   : > { %v3424_v28 = vpack.c.bf16 %v514_v25, %v513_v24 }
  0xc8   : > { %2921 = vmatmul.mubr.msk.bf16.vlgmr.msra.gmra.mxu0 %vm491_vm1, %v3424_v28  ;;  %2929 = vmatmul.mubr.msk.bf16.vlgmr.msra.gmra.mxu1 %vm491_vm1, %v3424_v28 }
  0xc9   : > { %2933 = vmatpush3.bf16.msra.mxu0 %v3179_v26  ;;  %2941 = vmatpush3.bf16.msra.mxu1 %v3180_v27 }
  0xca   : > { %2934 = vmatprep.subr.bf16.mxu0 %v3291_v10  ;;  %2942 = vmatprep.subr.bf16.mxu1 %v3291_v10 }
  0xcb   : > { %2936 = vmatprep.mubr.msk.bf16.mxu0 %vm3292_vm2, %v3291_v10  ;;  %2944 = vmatprep.mubr.msk.bf16.mxu1 %vm3292_vm2, %v3291_v10 }
  0xcd   : > { %2935 = vmatpush3.bf16.msra.mxu0 %v3181_v29  ;;  %2943 = vmatpush3.bf16.msra.mxu1 %v3182_v30 }
  0xce   : > { %2948 = vmatprep.subr.bf16.mxu0 %v3291_v10  ;;  %2956 = vmatprep.subr.bf16.mxu1 %v3291_v10 }
  0xd0   : > { %2937 = vmatmul.mubr.msk.bf16.vlgmr.msra.gmra.mxu0 %vm491_vm1, %v3424_v28  ;;  %2945 = vmatmul.mubr.msk.bf16.vlgmr.msra.gmra.mxu1 %vm491_vm1, %v3424_v28 }
  0xd1   : > { %2949 = vmatpush3.bf16.msra.mxu0 %v3183_v31  ;;  %2957 = vmatpush3.bf16.msra.mxu1 %v3184_v32 }
  0xd2   : > { %2950 = vmatprep.subr.bf16.mxu0 %v3291_v10  ;;  %2958 = vmatprep.subr.bf16.mxu1 %v3291_v10 }
  0xd3   : > { %2952 = vmatprep.mubr.msk.bf16.mxu0 %vm3292_vm2, %v3291_v10  ;;  %2960 = vmatprep.mubr.msk.bf16.mxu1 %vm3292_vm2, %v3291_v10 }
  0xd5   : > { %2951 = vmatpush3.bf16.msra.mxu0 %v3185_v33  ;;  %2959 = vmatpush3.bf16.msra.mxu1 %v3186_v34 }
  0xd6   : > { %2964 = vmatprep.subr.bf16.mxu0 %v3291_v10  ;;  %2972 = vmatprep.subr.bf16.mxu1 %v3291_v10 }
  0xd8   : > { %2953 = vmatmul.mubr.msk.bf16.vlgmr.msra.gmra.mxu0 %vm491_vm1, %v3424_v28  ;;  %2961 = vmatmul.mubr.msk.bf16.vlgmr.msra.gmra.mxu1 %vm491_vm1, %v3424_v28 }
  0xd9   : > { %2965 = vmatpush3.bf16.msra.mxu0 %v3187_v35  ;;  %2973 = vmatpush3.bf16.msra.mxu1 %v3188_v36 }
  0xda   : > { %2966 = vmatprep.subr.bf16.mxu0 %v3291_v10  ;;  %2974 = vmatprep.subr.bf16.mxu1 %v3291_v10 }
  0xdb   : > { %2968 = vmatprep.mubr.msk.bf16.mxu0 %vm3292_vm2, %v3291_v10  ;;  %2976 = vmatprep.mubr.msk.bf16.mxu1 %vm3292_vm2, %v3291_v10 }
  0xdd   : > { %2967 = vmatpush3.bf16.msra.mxu0 %v3189_v37  ;;  %2975 = vmatpush3.bf16.msra.mxu1 %v3190_v38 }
  0xde   : > { %2980 = vmatprep.subr.bf16.mxu0 %v3291_v10  ;;  %2988 = vmatprep.subr.bf16.mxu1 %v3291_v10 }
  0xe0   : > { %2969 = vmatmul.mubr.msk.bf16.vlgmr.msra.gmra.mxu0 %vm491_vm1, %v3424_v28  ;;  %2977 = vmatmul.mubr.msk.bf16.vlgmr.msra.gmra.mxu1 %vm491_vm1, %v3424_v28 }
  0xe1   : > { %2981 = vmatpush3.bf16.msra.mxu0 %v3191_v39  ;;  %2989 = vmatpush3.bf16.msra.mxu1 %v3192_v40 }
  0xe2   : > { %2982 = vmatprep.subr.bf16.mxu0 %v3291_v10  ;;  %2990 = vmatprep.subr.bf16.mxu1 %v3291_v10 }
  0xe3   : > { %2984 = vmatprep.mubr.msk.bf16.mxu0 %vm3292_vm2, %v3291_v10  ;;  %2992 = vmatprep.mubr.msk.bf16.mxu1 %vm3292_vm2, %v3291_v10 }
  0xe5   : > { %2983 = vmatpush3.bf16.msra.mxu0 %v3193_v41  ;;  %2991 = vmatpush3.bf16.msra.mxu1 %v3194_v42 }
  0xe6   : > { %2996 = vmatprep.subr.bf16.mxu0 %v3291_v10  ;;  %3004 = vmatprep.subr.bf16.mxu1 %v3291_v10 }
  0xe8   : > { %2985 = vmatmul.mubr.msk.bf16.vlgmr.msra.gmra.mxu0 %vm491_vm1, %v3424_v28  ;;  %2993 = vmatmul.mubr.msk.bf16.vlgmr.msra.gmra.mxu1 %vm491_vm1, %v3424_v28 }
  0xe9   : > { %2997 = vmatpush3.bf16.msra.mxu0 %v3195_v43  ;;  %3005 = vmatpush3.bf16.msra.mxu1 %v3196_v44 }
  0xea   : > { %2998 = vmatprep.subr.bf16.mxu0 %v3291_v10  ;;  %3006 = vmatprep.subr.bf16.mxu1 %v3291_v10 }
  0xeb   : > { %3000 = vmatprep.mubr.msk.bf16.mxu0 %vm3292_vm2, %v3291_v10  ;;  %3008 = vmatprep.mubr.msk.bf16.mxu1 %vm3292_vm2, %v3291_v10 }
  0xed   : > { %2999 = vmatpush3.bf16.msra.mxu0 %v3197_v45  ;;  %3007 = vmatpush3.bf16.msra.mxu1 %v3198_v46 }
  0xee   : > { %3012 = vmatprep.subr.bf16.mxu0 %v3291_v10  ;;  %3018 = vmatprep.subr.bf16.mxu1 %v3291_v10 }
  0xf0   : > { %3001 = vmatmul.mubr.msk.bf16.vlgmr.msra.gmra.mxu0 %vm491_vm1, %v3424_v28  ;;  %3009 = vmatmul.mubr.msk.bf16.vlgmr.msra.gmra.mxu1 %vm491_vm1, %v3424_v28 }
  0xf1   : > { %3014 = vmatprep.mubr.msk.bf16.mxu0 %vm3292_vm2, %v3291_v10  ;;  %3020 = vmatprep.mubr.msk.bf16.mxu1 %vm3292_vm2, %v3291_v10 }
 0x188   : > { %v3512_v47 = vpop.f32.mrf.mxu0  ;;  %v3514_v48 = vpop.f32.mrf.mxu1 }
 0x189   : > { %1203 = vrot.lane.b32.xlu1 %v3512_v47, %s3293_s14  ;;  %v1155_v55 = vsub.f32 0.0, %v3512_v47  ;;  %v1157_v60 = vsub.f32 0.0, %v3514_v48 }
 0x18a   : > { %v2922_v49 = vpop.f32.mrf.mxu0  ;;  %v2930_v50 = vpop.f32.mrf.mxu1 }
 0x18c   : > { %v3518_v51 = vpop.f32.mrf.mxu0  ;;  %v3520_v52 = vpop.f32.mrf.mxu1 }
 0x18d   : > { %1207 = vrot.lane.b32.xlu1 %v3514_v48, %s3293_s14  ;;  %1205 = vrot.lane.b32.xlu0 %v3518_v51, %s3293_s14  ;;  %v1156_v61 = vsub.f32 0.0, %v3518_v51  ;;  %v1158_v2 = vsub.f32 0.0, %v3520_v52 }
 0x18e   : > { %v2923_v53 = vpop.f32.mrf.mxu0  ;;  %v2931_v54 = vpop.f32.mrf.mxu1 }
 0x190   : > { %v3527_v56 = vpop.f32.mrf.mxu0  ;;  %v3529_v57 = vpop.f32.mrf.mxu1 }
 0x191   : > { %1171 = vrot.lane.b32.xlu1 %v1155_v55, %s3294_s22  ;;  %1209 = vrot.lane.b32.xlu0 %v3520_v52, %s3293_s14  ;;  %v1159_v7 = vsub.f32 0.0, %v3527_v56  ;;  %v1161_v55 = vsub.f32 0.0, %v3529_v57 }
 0x192   : > { %v2938_v58 = vpop.f32.mrf.mxu0  ;;  %v2946_v59 = vpop.f32.mrf.mxu1 }
 0x194   : > { %v3536_v62 = vpop.f32.mrf.mxu0  ;;  %v3538_v63 = vpop.f32.mrf.mxu1 }
 0x195   : > { %1175 = vrot.lane.b32.xlu1 %v1157_v60, %s3294_s22  ;;  %1173 = vrot.lane.b32.xlu0 %v1156_v61, %s3294_s22  ;;  %v1160_v13 = vsub.f32 0.0, %v3536_v62  ;;  %v1162_v49 = vsub.f32 0.0, %v3538_v63 }
 0x196   : > { %v2939_v0 = vpop.f32.mrf.mxu0  ;;  %v2947_v1 = vpop.f32.mrf.mxu1 }
 0x197   : > { %v3619_v1 = vld [vmem:[%s3949_s2] sm:$0xff] }
 0x198   : > { %v3543_v3 = vpop.f32.mrf.mxu0  ;;  %v3545_v4 = vpop.f32.mrf.mxu1 }
 0x199   : > { %1177 = vrot.lane.b32.xlu0 %v1158_v2, %s3294_s22  ;;  %1211 = vrot.lane.b32.xlu1 %v3527_v56, %s3293_s14  ;;  %v1264_v18 = vsub.f32 0.0, %v3543_v3  ;;  %v1266_v23 = vsub.f32 0.0, %v3545_v4 }
 0x19a   : > { %v2954_v5 = vpop.f32.mrf.mxu0  ;;  %v2962_v6 = vpop.f32.mrf.mxu1 }
 0x19b   : > { %v3625_v5 = vld [vmem:[%s3948_s1] sm:$0xff]  ;;  %v3630_v6 = vld [vmem:[%s3948_s1 + $0x8] sm:$0xff] }
 0x19c   : > { %v3551_v8 = vpop.f32.mrf.mxu0  ;;  %v3553_v9 = vpop.f32.mrf.mxu1 }
 0x19d   : > { %1179 = vrot.lane.b32.xlu1 %v1159_v7, %s3294_s22  ;;  %1213 = vrot.lane.b32.xlu0 %v3536_v62, %s3293_s14  ;;  %v1265_v39 = vsub.f32 0.0, %v3551_v8  ;;  %v1267_v50 = vsub.f32 0.0, %v3553_v9  ;;  %v3635_v7 = vld [vmem:[%s3949_s2 + $0x8] sm:$0xff] }
 0x19e   : > { %v2955_v11 = vpop.f32.mrf.mxu0  ;;  %v2963_v12 = vpop.f32.mrf.mxu1 }
 0x1a0   : > { %v3559_v14 = vpop.f32.mrf.mxu0  ;;  %v3561_v15 = vpop.f32.mrf.mxu1 }
 0x1a1   : > { %1316 = vrot.lane.b32.xlu1 %v3545_v4, %s3293_s14  ;;  %1181 = vrot.lane.b32.xlu0 %v1160_v13, %s3294_s22  ;;  %v1268_v53 = vsub.f32 0.0, %v3559_v14  ;;  %v1270_v54 = vsub.f32 0.0, %v3561_v15 }
 0x1a2   : > { %v2970_v16 = vpop.f32.mrf.mxu0  ;;  %v2978_v17 = vpop.f32.mrf.mxu1 }
 0x1a4   : > { %v3567_v19 = vpop.f32.mrf.mxu0  ;;  %v3569_v20 = vpop.f32.mrf.mxu1 }
 0x1a5   : > { %1312 = vrot.lane.b32.xlu0 %v3543_v3, %s3293_s14  ;;  %1280 = vrot.lane.b32.xlu1 %v1264_v18, %s3294_s22  ;;  %v1269_v34 = vsub.f32 0.0, %v3567_v19  ;;  %v1271_v40 = vsub.f32 0.0, %v3569_v20  ;;  %v1236_v18 = vmul.f32 %v3512_v47, %v3625_v5 }
 0x1a6   : > { %v2971_v21 = vpop.f32.mrf.mxu0  ;;  %v2979_v22 = vpop.f32.mrf.mxu1 }
 0x1a7   : > { %v1237_v21 = vmul.f32 %v3518_v51, %v3630_v6 }
 0x1a8   : > { %v989_v24 = vpop.f32.mrf.mxu0  ;;  %v1042_v25 = vpop.f32.mrf.mxu1 }
 0x1a9   : > { %1284 = vrot.lane.b32.xlu1 %v1266_v23, %s3294_s22  ;;  %1322 = vrot.lane.b32.xlu0 %v3567_v19, %s3293_s14 }
 0x1aa   : > { %v2986_v26 = vpop.f32.mrf.mxu0  ;;  %v2994_v27 = vpop.f32.mrf.mxu1 }
 0x1ac   : > { %v992_v28 = vpop.f32.mrf.mxu0  ;;  %v1045_v29 = vpop.f32.mrf.mxu1 }
 0x1ad   : > { %v3578_v30 = vpack.c.bf16 %v992_v28, %v989_v24  ;;  %v3580_v31 = vpack.c.bf16 %v1045_v29, %v1042_v25  ;;  %1314 = vrot.lane.b32.xlu1 %v3551_v8, %s3293_s14  ;;  %1326 = vrot.lane.b32.xlu0 %v3569_v20, %s3293_s14  ;;  %v1238_v29 = vmul.f32 %v3514_v48, %v3625_v5 }
 0x1ae   : > { %v2987_v32 = vpop.f32.mrf.mxu0  ;;  %v2995_v33 = vpop.f32.mrf.mxu1 }
 0x1af   : > { %v1239_v32 = vmul.f32 %v3520_v52, %v3630_v6  ;;  %v1240_v52 = vmul.f32 %v3527_v56, %v3625_v5 }
 0x1b0   : > { %v1095_v35 = vpop.f32.mrf.mxu0  ;;  %v1148_v36 = vpop.f32.mrf.mxu1 }
 0x1b1   : > { %1318 = vrot.lane.b32.xlu1 %v3553_v9, %s3293_s14  ;;  %1290 = vrot.lane.b32.xlu0 %v1269_v34, %s3294_s22 }
 0x1b2   : > { %v3002_v37 = vpop.f32.mrf.mxu0  ;;  %v3010_v38 = vpop.f32.mrf.mxu1 }
 0x1b4   : > { %v1098_v41 = vpop.f32.mrf.mxu0  ;;  %v1151_v42 = vpop.f32.mrf.mxu1 }
 0x1b5   : > { %v3592_v43 = vpack.c.bf16 %v1098_v41, %v1095_v35  ;;  %v3594_v44 = vpack.c.bf16 %v1151_v42, %v1148_v36  ;;  %1282 = vrot.lane.b32.xlu1 %v1265_v39, %s3294_s22  ;;  %1294 = vrot.lane.b32.xlu0 %v1271_v40, %s3294_s22  ;;  %v1241_v42 = vmul.f32 %v3536_v62, %v3630_v6 }
 0x1b6   : > { %v3003_v45 = vpop.f32.mrf.mxu0  ;;  %v3011_v46 = vpop.f32.mrf.mxu1 }
 0x1b9   : > { %1286 = vrot.lane.b32.xlu1 %v1267_v50, %s3294_s22  ;;  %1185 = vrot.lane.b32.xlu0 %v1162_v49, %s3294_s22 }
 0x1bd   : > { %1320 = vrot.lane.b32.xlu1 %v3559_v14, %s3293_s14  ;;  %1217 = vrot.lane.b32.xlu0 %v3538_v63, %s3293_s14 }
 0x1c1   : > { %1324 = vrot.lane.b32.xlu1 %v3561_v15, %s3293_s14 }
 0x1c5   : > { %1288 = vrot.lane.b32.xlu1 %v1268_v53, %s3294_s22 }
 0x1c9   : > { %1292 = vrot.lane.b32.xlu1 %v1270_v54, %s3294_s22 }
 0x1cd   : > { %1183 = vrot.lane.b32.xlu1 %v1161_v55, %s3294_s22 }
 0x1d1   : > { %1215 = vrot.lane.b32.xlu1 %v3529_v57, %s3293_s14 }
 0x1fb   : > { %v1204_v58 = vpop.permute.xlu1 %1203 }
 0x1ff   : > { %v1208_v59 = vpop.permute.xlu1 %1207  ;;  %v1206_v60 = vpop.permute.xlu0 %1205 }
 0x203   : > { %v1172_v61 = vpop.permute.xlu1 %1171  ;;  %v1210_v0 = vpop.permute.xlu0 %1209 }
 0x204   : > { %v1228_v2 = vsel %vm1227_vm3, %v1172_v61, %v1204_v58 }
 0x205   : > { %v1244_v11 = vmul.f32 %v1228_v2, %v3619_v1 }
 0x207   : > { %v1176_v12 = vpop.permute.xlu1 %1175  ;;  %v1174_v13 = vpop.permute.xlu0 %1173  ;;  %v1252_v23 = vadd.f32 %v1244_v11, %v1236_v18 }
 0x208   : > { %v1230_v16 = vsel %vm1227_vm3, %v1176_v12, %v1208_v59  ;;  %v1229_v17 = vsel %vm1227_vm3, %v1174_v13, %v1206_v60  ;;  %v1344_v12 = vmul.f32 %v3543_v3, %v3625_v5  ;;  %v1345_v13 = vmul.f32 %v3551_v8, %v3630_v6 }
 0x209   : > { %v1245_v22 = vmul.f32 %v1229_v17, %v3635_v7  ;;  %v1246_v24 = vmul.f32 %v1230_v16, %v3619_v1  ;;  %v1347_v3 = vmul.f32 %v3553_v9, %v3630_v6 }
 0x20b   : > { %v1253_v25 = vadd.f32 %v1245_v22, %v1237_v21  ;;  %v1178_v26 = vpop.permute.xlu0 %1177  ;;  %v1212_v27 = vpop.permute.xlu1 %1211  ;;  %v1254_v33 = vadd.f32 %v1246_v24, %v1238_v29 }
 0x20c   : > { %v1231_v28 = vsel %vm1227_vm3, %v1178_v26, %v1210_v0 }
 0x20d   : > { %v3651_v47 = vpack.c.bf16 %v1253_v25, %v1252_v23  ;;  %v1247_v51 = vmul.f32 %v1231_v28, %v3635_v7  ;;  %v1346_v25 = vmul.f32 %v3545_v4, %v3625_v5 }
 0x20f   : > { %v1255_v34 = vadd.f32 %v1247_v51, %v1239_v32  ;;  %v1180_v35 = vpop.permute.xlu1 %1179  ;;  %v1214_v36 = vpop.permute.xlu0 %1213 }
 0x210   : > { %v1232_v37 = vsel %vm1227_vm3, %v1180_v35, %v1212_v27 }
 0x211   : > { %v3655_v38 = vpack.c.bf16 %v1255_v34, %v1254_v33  ;;  %v1248_v39 = vmul.f32 %v1232_v37, %v3619_v1 }
 0x213   : > { %v1317_v40 = vpop.permute.xlu1 %1316  ;;  %v1182_v41 = vpop.permute.xlu0 %1181  ;;  %v1256_v46 = vadd.f32 %v1248_v39, %v1240_v52 }
 0x214   : > { %v1233_v48 = vsel %vm1227_vm3, %v1182_v41, %v1214_v36  ;;  %v1348_v41 = vmul.f32 %v3559_v14, %v3625_v5  ;;  %v1350_v14 = vmul.f32 %v3561_v15, %v3625_v5 }
 0x215   : > { %v1249_v45 = vmul.f32 %v1233_v48, %v3635_v7  ;;  %v1349_v48 = vmul.f32 %v3567_v19, %v3630_v6  ;;  %v1351_v19 = vmul.f32 %v3569_v20, %v3630_v6 }
 0x217   : > { %v1257_v49 = vadd.f32 %v1249_v45, %v1241_v42  ;;  %v1281_v50 = vpop.permute.xlu1 %1280  ;;  %v1313_v54 = vpop.permute.xlu0 %1312 }
 0x218   : > { %v1336_v61 = vsel %vm1227_vm3, %v1281_v50, %v1313_v54 }
 0x219   : > { %v3664_v53 = vpack.c.bf16 %v1257_v49, %v1256_v46  ;;  %v1352_v56 = vmul.f32 %v1336_v61, %v3619_v1 }
 0x21b   : > { %v1285_v55 = vpop.permute.xlu1 %1284  ;;  %v1323_v58 = vpop.permute.xlu0 %1322  ;;  %v1360_v17 = vadd.f32 %v1352_v56, %v1344_v12  ;;  %v1242_v12 = vmul.f32 %v3529_v57, %v3625_v5 }
 0x21c   : > { %v1338_v62 = vsel %vm1227_vm3, %v1285_v55, %v1317_v40 }
 0x21d   : > { %v1354_v18 = vmul.f32 %v1338_v62, %v3619_v1 }
 0x21f   : > { %v1315_v59 = vpop.permute.xlu1 %1314  ;;  %v1327_v0 = vpop.permute.xlu0 %1326  ;;  %v1362_v27 = vadd.f32 %v1354_v18, %v1346_v25 }
 0x223   : > { %v1319_v60 = vpop.permute.xlu1 %1318  ;;  %v1291_v21 = vpop.permute.xlu0 %1290 }
 0x224   : > { %v1341_v34 = vsel %vm1227_vm3, %v1291_v21, %v1323_v58 }
 0x225   : > { %v1357_v35 = vmul.f32 %v1341_v34, %v3635_v7 }
 0x227   : > { %v1283_v2 = vpop.permute.xlu1 %1282  ;;  %v1295_v51 = vpop.permute.xlu0 %1294  ;;  %v1365_v42 = vadd.f32 %v1357_v35, %v1349_v48 }
 0x228   : > { %v1337_v11 = vsel %vm1227_vm3, %v1283_v2, %v1315_v59  ;;  %v1343_v39 = vsel %vm1227_vm3, %v1295_v51, %v1327_v0 }
 0x229   : > { %v1353_v16 = vmul.f32 %v1337_v11, %v3635_v7  ;;  %v1359_v45 = vmul.f32 %v1343_v39, %v3635_v7 }
 0x22b   : > { %v1361_v22 = vadd.f32 %v1353_v16, %v1345_v13  ;;  %v1287_v23 = vpop.permute.xlu1 %1286  ;;  %v1186_v36 = vpop.permute.xlu0 %1185  ;;  %v1367_v59 = vadd.f32 %v1359_v45, %v1351_v19  ;;  %v1243_v13 = vmul.f32 %v3538_v63, %v3630_v6  ;;  %v1673_v63 = vsel %vm1625_vm5, %v3580_v31, 0 }
 0x22c   : > { %v1339_v24 = vsel %vm1227_vm3, %v1287_v23, %v1319_v60 }
 0x22d   : > { %v1355_v26 = vmul.f32 %v1339_v24, %v3635_v7  ;;  %v3682_v8 = vpack.c.bf16 %v1361_v22, %v1360_v17 }
 0x22f   : > { %v1363_v28 = vadd.f32 %v1355_v26, %v1347_v3  ;;  %v1321_v29 = vpop.permute.xlu1 %1320  ;;  %v1386_v32 = vsel %vm1381_vm4, %v3682_v8, 0  ;;  %v1218_v54 = vpop.permute.xlu0 %1217 }
 0x230   : > { %3013 = vmatpush3.bf16.xpose.msra.mxu0 %v1386_v32  ;;  %v1235_v56 = vsel %vm1227_vm3, %v1186_v36, %v1218_v54 }
 0x231   : > { %v3686_v33 = vpack.c.bf16 %v1363_v28, %v1362_v27  ;;  %3024 = vmatprep.subr.bf16.mxu0 %v3291_v10  ;;  %v1251_v15 = vmul.f32 %v1235_v56, %v3635_v7  ;;  %v1627_v7 = vsel %vm1625_vm5, %v3578_v30, 0 }
 0x233   : > { %v1325_v4 = vpop.permute.xlu1 %1324  ;;  %v1432_v9 = vsel %vm1381_vm4, %v3686_v33, 0  ;;  %v1259_v17 = vadd.f32 %v1251_v15, %v1243_v13 }
 0x234   : > { %3019 = vmatpush3.bf16.xpose.msra.mxu1 %v1432_v9 }
 0x235   : > { %3030 = vmatprep.subr.bf16.mxu1 %v3291_v10 }
 0x237   : > { %3015 = vmatmul.mubr.msk.bf16.vlgmr.msra.gmra.mxu0 %vm1381_vm4, %v3651_v47  ;;  %v1289_v37 = vpop.permute.xlu1 %1288 }
 0x238   : > { %v1340_v40 = vsel %vm1227_vm3, %v1289_v37, %v1321_v29  ;;  %3026 = vmatprep.mubr.msk.bf16.mxu0 %vm3292_vm2, %v3291_v10 }
 0x239   : > { %v1356_v52 = vmul.f32 %v1340_v40, %v3619_v1 }
 0x23b   : > { %v1364_v46 = vadd.f32 %v1356_v52, %v1348_v41  ;;  %3021 = vmatmul.mubr.msk.bf16.vlgmr.msra.gmra.mxu1 %vm1381_vm4, %v3655_v38  ;;  %v1293_v49 = vpop.permute.xlu1 %1292 }
 0x23c   : > { %v1342_v50 = vsel %vm1227_vm3, %v1293_v49, %v1325_v4  ;;  %3032 = vmatprep.mubr.msk.bf16.mxu1 %vm3292_vm2, %v3291_v10 }
 0x23d   : > { %v1358_v55 = vmul.f32 %v1342_v50, %v3619_v1  ;;  %v3716_v58 = vpack.c.bf16 %v1365_v42, %v1364_v46 }
 0x23f   : > { %v1366_v60 = vadd.f32 %v1358_v55, %v1350_v14  ;;  %v1184_v61 = vpop.permute.xlu1 %1183  ;;  %v1478_v0 = vsel %vm1381_vm4, %v3716_v58, 0 }
 0x240   : > { %3025 = vmatpush3.bf16.xpose.msra.mxu0 %v1478_v0 }
 0x241   : > { %v3721_v2 = vpack.c.bf16 %v1367_v59, %v1366_v60  ;;  %3036 = vmatprep.subr.bf16.mxu0 %v3291_v10 }
 0x243   : > { %v1216_v20 = vpop.permute.xlu1 %1215  ;;  %v1524_v62 = vsel %vm1381_vm4, %v3721_v2, 0 }
 0x244   : > { %v1234_v11 = vsel %vm1227_vm3, %v1184_v61, %v1216_v20  ;;  %3031 = vmatpush3.bf16.xpose.msra.mxu1 %v1524_v62 }
 0x245   : > { %v1250_v16 = vmul.f32 %v1234_v11, %v3619_v1  ;;  %3042 = vmatprep.subr.bf16.mxu1 %v3291_v10  ;;  %v1376_v1 = vlaneseq }
 0x247   : > { %v1258_v18 = vadd.f32 %v1250_v16, %v1242_v12  ;;  %3027 = vmatmul.mubr.msk.bf16.vlgmr.msra.gmra.mxu0 %vm1381_vm4, %v3664_v53  ;;  %v1377_v5 = vshrl.u32 %v1376_v1, 7  ;;  %v1379_v6 = vand.u32 127, %v1376_v1 }
 0x248   : > { %3037 = vmatpush3.bf16.msra.mxu0 %v1627_v7  ;;  %3038 = vmatprep.mubr.msk.bf16.mxu0 %vm3292_vm2, %v3291_v10 }
 0x249   : > { %v3740_v57 = vpack.c.bf16 %v1259_v17, %v1258_v18  ;;  %3048 = vmatprep.subr.bf16.mxu0 %v3291_v10  ;;  %vm3750_vm6 = vcmp.ge.s32.totalorder %v1377_v5, %v1379_v6 }
 0x24b   : > { %3033 = vmatmul.mubr.msk.bf16.vlgmr.msra.gmra.mxu1 %vm1381_vm4, %v3740_v57 }
 0x24c   : > { %3043 = vmatpush3.bf16.msra.mxu1 %v1673_v63  ;;  %3044 = vmatprep.mubr.msk.bf16.mxu1 %vm3292_vm2, %v3291_v10 }
 0x24d   : > { %3054 = vmatprep.subr.bf16.mxu1 %v3291_v10 }
 0x2f7   : > { %v1422_v21 = vpop.f32.mrf.mxu0 }
 0x2f8   : > { %v1566_v23 = vmul.f32 0.35355338, %v1422_v21 }
 0x2f9   : > { %v3016_v24 = vpop.f32.mrf.mxu0 }
 0x2fa   : > { %v1570_v25 = vsel %vm3750_vm6, %v1566_v23, -1e+30 }
 0x2fb   : > { %v1425_v3 = vpop.f32.mrf.mxu0  ;;  %v1468_v26 = vpop.f32.mrf.mxu1  ;;  %v1574_v27 = vsel %vm1381_vm4, %v1570_v25, -inf }
 0x2fc   : > { %v1567_v28 = vmul.f32 0.35355338, %v1468_v26  ;;  %1575 = vmax.xlane.f32.xlu1 %v1574_v27  ;;  %v1719_v26 = vsel %vm1625_vm5, %v3592_v43, 0 }
 0x2fd   : > { %v3017_v29 = vpop.f32.mrf.mxu0  ;;  %v3022_v32 = vpop.f32.mrf.mxu1 }
 0x2fe   : > { %v1571_v51 = vsel %vm3750_vm6, %v1567_v28, -1e+30  ;;  %v1765_v32 = vsel %vm1625_vm5, %v3594_v44, 0 }
 0x2ff   : > { %v1471_v4 = vpop.f32.mrf.mxu1  ;;  %v1577_v9 = vsel %vm1381_vm4, %v1571_v51, -inf }
 0x300   : > { %1578 = vmax.xlane.f32.xlu0 %v1577_v9  ;;  %v1810_v9 = vrot.slane %v3682_v8, 4 }
 0x301   : > { %v3023_v34 = vpop.f32.mrf.mxu1 }
 0x307   : > { %v1514_v35 = vpop.f32.mrf.mxu0 }
 0x308   : > { %v1568_v36 = vmul.f32 0.35355338, %v1514_v35 }
 0x309   : > { %v3028_v37 = vpop.f32.mrf.mxu0 }
 0x30a   : > { %v1572_v39 = vsel %vm3750_vm6, %v1568_v36, -1e+30  ;;  %v1815_v36 = vsel %vm1381_vm4, %v1810_v9, 0 }
 0x30b   : > { %v1517_v40 = vpop.f32.mrf.mxu0  ;;  %v1560_v41 = vpop.f32.mrf.mxu1  ;;  %v1580_v48 = vsel %vm1381_vm4, %v1572_v39, -inf }
 0x30c   : > { %v1569_v52 = vmul.f32 0.35355338, %v1560_v41  ;;  %1581 = vmax.xlane.f32.xlu0 %v1580_v48  ;;  %v1910_v41 = vrot.slane %v3716_v58, 4  ;;  %v1808_v48 = vrot.slane %v3651_v47, 4  ;;  %v1858_v58 = vrot.slane %v3655_v38, 4 }
 0x30d   : > { %v3029_v42 = vpop.f32.mrf.mxu0  ;;  %v3034_v45 = vpop.f32.mrf.mxu1 }
 0x30e   : > { %v1573_v46 = vsel %vm3750_vm6, %v1569_v52, -1e+30  ;;  %v1960_v52 = vrot.slane %v3721_v2, 4  ;;  %v2064_v42 = vrot.slane %v3578_v30, 4  ;;  %v1908_v2 = vrot.slane %v3664_v53, 4 }
 0x30f   : > { %v1563_v49 = vpop.f32.mrf.mxu1  ;;  %v1583_v50 = vsel %vm1381_vm4, %v1573_v46, -inf  ;;  %v2112_v45 = vrot.slane %v3580_v31, 4  ;;  %v1958_v30 = vrot.slane %v3740_v57, 4 }
 0x310   : > { %1584 = vmax.xlane.f32.xlu1 %v1583_v50  ;;  %v1965_v47 = vsel %vm1381_vm4, %v1960_v52, 0  ;;  %v2069_v38 = vsel %vm1625_vm5, %v2064_v42, 0 }
 0x311   : > { %v3035_v14 = vpop.f32.mrf.mxu1  ;;  %v2117_v53 = vsel %vm1625_vm5, %v2112_v45, 0 }
 0x385   : > { %v1576_v19 = vpop.xlane.xlu1 %1575 }
 0x386   : > { %v1586_v54 = vsub.f32 %v1570_v25, %v1576_v19 }
 0x388   : > { %v1590_v55 = vmul.f32 1.442695, %v1586_v54 }
 0x389   : > { %v1579_v59 = vpop.xlane.xlu0 %1578 }
 0x38a   : > { %3209 = vpow2.f32 %v1590_v55  ;;  %v1587_v60 = vsub.f32 %v1571_v51, %v1579_v59 }
 0x38c   : > { %v1592_v61 = vmul.f32 1.442695, %v1587_v60 }
 0x38e   : > { %3211 = vpow2.f32 %v1592_v61 }
 0x395   : > { %v1582_v0 = vpop.xlane.xlu0 %1581 }
 0x396   : > { %v1588_v56 = vsub.f32 %v1572_v39, %v1582_v0  ;;  %v1860_v39 = vrot.slane %v3686_v33, 4  ;;  %v1915_v33 = vsel %vm1381_vm4, %v1910_v41, 0 }
 0x397   : > { %v3210_v15 = vpop.eup %3209 }
 0x398   : > { %v1594_v20 = vmul.f32 1.442695, %v1588_v56  ;;  %v1598_v62 = vsel %vm1381_vm4, %v3210_v15, 0.0  ;;  %v1865_v8 = vsel %vm1381_vm4, %v1860_v39, 0 }
 0x399   : > { %v1585_v11 = vpop.xlane.xlu1 %1584  ;;  %1599 = vadd.xlane.f32.xlu0 %v1598_v62 }
 0x39a   : > { %3213 = vpow2.f32 %v1594_v20  ;;  %v1589_v12 = vsub.f32 %v1573_v46, %v1585_v11 }
 0x39b   : > { %v3212_v13 = vpop.eup %3211 }
 0x39c   : > { %v1596_v16 = vmul.f32 1.442695, %v1589_v12  ;;  %v1601_v7 = vsel %vm1381_vm4, %v3212_v13, 0.0 }
 0x39d   : > { %1602 = vadd.xlane.f32.xlu1 %v1601_v7 }
 0x39e   : > { %3215 = vpow2.f32 %v1596_v16 }
 0x3a7   : > { %v3214_v17 = vpop.eup %3213 }
 0x3a8   : > { %v1604_v18 = vsel %vm1381_vm4, %v3214_v17, 0.0 }
 0x3a9   : > { %1605 = vadd.xlane.f32.xlu0 %v1604_v18 }
 0x3ab   : > { %v3216_v63 = vpop.eup %3215 }
 0x3ac   : > { %v1607_v1 = vsel %vm1381_vm4, %v3216_v63, 0.0 }
 0x3ad   : > { %1608 = vadd.xlane.f32.xlu1 %v1607_v1 }
 0x422   : > { %v1600_v5 = vpop.xlane.xlu0 %1599 }
 0x423   : > { %3217 = vrcp.f32 %v1600_v5 }
 0x426   : > { %v1603_v6 = vpop.xlane.xlu1 %1602 }
 0x427   : > { %3219 = vrcp.f32 %v1603_v6 }
 0x430   : > { %v3218_v21 = vpop.eup %3217 }
 0x431   : > { %v1614_v23 = vmul.f32 %v3218_v21, %v3210_v15 }
 0x432   : > { %v1606_v24 = vpop.xlane.xlu0 %1605 }
 0x433   : > { %3221 = vrcp.f32 %v1606_v24  ;;  %v1618_v25 = vpack.c.bf16 %v1614_v23, %v1614_v23 }
 0x434   : > { %v3220_v3 = vpop.eup %3219 }
 0x435   : > { %3039 = vmatmul.mubr.msk.bf16.vlgmr.msra.gmra.mxu0 %vm1381_vm4, %v1618_v25  ;;  %v1615_v27 = vmul.f32 %v3220_v3, %v3212_v13 }
 0x436   : > { %3049 = vmatpush3.bf16.msra.mxu0 %v1719_v26  ;;  %v1609_v28 = vpop.xlane.xlu1 %1608  ;;  %3050 = vmatprep.mubr.msk.bf16.mxu0 %vm3292_vm2, %v3291_v10 }
 0x437   : > { %3223 = vrcp.f32 %v1609_v28  ;;  %v1619_v29 = vpack.c.bf16 %v1615_v27, %v1615_v27  ;;  %3060 = vmatprep.subr.bf16.mxu0 %v3291_v10 }
 0x439   : > { %3045 = vmatmul.mubr.msk.bf16.vlgmr.msra.gmra.mxu1 %vm1381_vm4, %v1619_v29 }
 0x43a   : > { %3055 = vmatpush3.bf16.msra.mxu1 %v1765_v32  ;;  %3056 = vmatprep.mubr.msk.bf16.mxu1 %vm3292_vm2, %v3291_v10 }
 0x43b   : > { %3066 = vmatprep.subr.bf16.mxu1 %v3291_v10 }
 0x440   : > { %v3222_v51 = vpop.eup %3221 }
 0x441   : > { %v1616_v4 = vmul.f32 %v3222_v51, %v3214_v17 }
 0x443   : > { %v1620_v34 = vpack.c.bf16 %v1616_v4, %v1616_v4 }
 0x444   : > { %v3224_v35 = vpop.eup %3223 }
 0x445   : > { %3051 = vmatmul.mubr.msk.bf16.vlgmr.msra.gmra.mxu0 %vm1381_vm4, %v1620_v34  ;;  %v1617_v37 = vmul.f32 %v3224_v35, %v3216_v63 }
 0x446   : > { %3061 = vmatpush3.bf16.xpose.msra.mxu0 %v1815_v36  ;;  %3062 = vmatprep.mubr.msk.bf16.mxu0 %vm3292_vm2, %v3291_v10 }
 0x447   : > { %v1621_v40 = vpack.c.bf16 %v1617_v37, %v1617_v37  ;;  %3072 = vmatprep.subr.bf16.mxu0 %v3291_v10 }
 0x449   : > { %3057 = vmatmul.mubr.msk.bf16.vlgmr.msra.gmra.mxu1 %vm1381_vm4, %v1621_v40 }
 0x44a   : > { %3067 = vmatpush3.bf16.xpose.msra.mxu1 %v1865_v8  ;;  %3068 = vmatprep.mubr.msk.bf16.mxu1 %vm3292_vm2, %v3291_v10 }
 0x44b   : > { %3078 = vmatprep.subr.bf16.mxu1 %v3291_v10 }
 0x44d   : > { %3063 = vmatmul.mubr.msk.bf16.vlgmr.msra.gmra.mxu0 %vm1381_vm4, %v1808_v48 }
 0x44e   : > { %3073 = vmatpush3.bf16.xpose.msra.mxu0 %v1915_v33  ;;  %3074 = vmatprep.mubr.msk.bf16.mxu0 %vm3292_vm2, %v3291_v10 }
 0x44f   : > { %3084 = vmatprep.subr.bf16.mxu0 %v3291_v10 }
 0x451   : > { %3069 = vmatmul.mubr.msk.bf16.vlgmr.msra.gmra.mxu1 %vm1381_vm4, %v1858_v58 }
 0x452   : > { %3079 = vmatpush3.bf16.xpose.msra.mxu1 %v1965_v47  ;;  %3080 = vmatprep.mubr.msk.bf16.mxu1 %vm3292_vm2, %v3291_v10 }
 0x453   : > { %3090 = vmatprep.subr.bf16.mxu1 %v3291_v10 }
 0x455   : > { %3075 = vmatmul.mubr.msk.bf16.vlgmr.msra.gmra.mxu0 %vm1381_vm4, %v1908_v2 }
 0x456   : > { %3085 = vmatpush3.bf16.msra.mxu0 %v2069_v38  ;;  %3086 = vmatprep.mubr.msk.bf16.mxu0 %vm3292_vm2, %v3291_v10 }
 0x457   : > { %3096 = vmatprep.subr.bf16.mxu0 %v3291_v10 }
 0x459   : > { %3081 = vmatmul.mubr.msk.bf16.vlgmr.msra.gmra.mxu1 %vm1381_vm4, %v1958_v30 }
 0x45a   : > { %3091 = vmatpush3.bf16.msra.mxu1 %v2117_v53  ;;  %3092 = vmatprep.mubr.msk.bf16.mxu1 %vm3292_vm2, %v3291_v10 }
 0x45b   : > { %3102 = vmatprep.subr.bf16.mxu1 %v3291_v10 }
 0x4f5   : > { %v3822_v31 = vpop.f32.mrf.mxu0 }
 0x4f7   : > { %v3040_v46 = vpop.f32.mrf.mxu0 }
 0x4f9   : > { %v1666_v49 = vpop.f32.mrf.mxu0  ;;  %v3824_v50 = vpop.f32.mrf.mxu1 }
 0x4fb   : > { %v3041_v14 = vpop.f32.mrf.mxu0  ;;  %v3046_v57 = vpop.f32.mrf.mxu1 }
 0x4fd   : > { %v1712_v19 = vpop.f32.mrf.mxu1 }
 0x4ff   : > { %v3047_v54 = vpop.f32.mrf.mxu1 }
 0x505   : > { %v3826_v55 = vpop.f32.mrf.mxu0 }
 0x507   : > { %v3052_v59 = vpop.f32.mrf.mxu0 }
 0x509   : > { %v1758_v60 = vpop.f32.mrf.mxu0  ;;  %v3828_v61 = vpop.f32.mrf.mxu1 }
 0x50b   : > { %v3053_v0 = vpop.f32.mrf.mxu0  ;;  %v3058_v56 = vpop.f32.mrf.mxu1 }
 0x50c   : > { %v2160_v0 = vrot.slane %v3592_v43, 4 }
 0x50d   : > { %v1804_v15 = vpop.f32.mrf.mxu1  ;;  %v1851_v20 = vpop.f32.mrf.mxu0 }
 0x50e   : > { %v2007_v62 = vmul.f32 0.35355338, %v1851_v20 }
 0x50f   : > { %v3059_v11 = vpop.f32.mrf.mxu1  ;;  %v3064_v12 = vpop.f32.mrf.mxu0 }
 0x510   : > { %v2011_v13 = vsel %vm3750_vm6, %v2007_v62, -1e+30  ;;  %v2208_v62 = vrot.slane %v3594_v44, 4  ;;  %v2165_v11 = vsel %vm1625_vm5, %v2160_v0, 0 }
 0x511   : > { %v1854_v16 = vpop.f32.mrf.mxu0  ;;  %v1901_v7 = vpop.f32.mrf.mxu1  ;;  %v2015_v17 = vsel %vm1381_vm4, %v2011_v13, -inf }
 0x512   : > { %v2008_v18 = vmul.f32 0.35355338, %v1901_v7  ;;  %2016 = vmax.xlane.f32.xlu0 %v2015_v17  ;;  %v472_v7 = vld [vmem:[%s3381_s25] sm:$0xf]  ;;  %v2213_v43 = vsel %vm1625_vm5, %v2208_v62, 0 }
 0x513   : > { %v3065_v63 = vpop.f32.mrf.mxu0  ;;  %v3070_v1 = vpop.f32.mrf.mxu1 }
 0x514   : > { %v2012_v5 = vsel %vm3750_vm6, %v2008_v18, -1e+30  ;;  %v2263_v18 = vsel %vm1625_vm5, %v472_v7, 0 }
 0x515   : > { %v1904_v6 = vpop.f32.mrf.mxu1  ;;  %v1951_v21 = vpop.f32.mrf.mxu0  ;;  %v2018_v23 = vsel %vm1381_vm4, %v2012_v5, -inf }
 0x516   : > { %v2009_v24 = vmul.f32 0.35355338, %v1951_v21  ;;  %2019 = vmax.xlane.f32.xlu1 %v2018_v23  ;;  %v473_v6 = vld [vmem:[%s3381_s25 + $0x4] sm:$0xf]  ;;  %v474_v23 = vld [vmem:[%s3381_s25 + $0x8] sm:$0xf] }
 0x517   : > { %v3071_v25 = vpop.f32.mrf.mxu1  ;;  %v3076_v3 = vpop.f32.mrf.mxu0  ;;  %v2310_v21 = vsel %vm1625_vm5, %v473_v6, 0 }
 0x518   : > { %v2013_v26 = vsel %vm3750_vm6, %v2009_v24, -1e+30  ;;  %v2357_v3 = vsel %vm1625_vm5, %v474_v23, 0  ;;  %v3200_v23 = vld [vmem:[%s3386_s28] sm:$0xff]  }
 0x519   : > { %v1954_v27 = vpop.f32.mrf.mxu0  ;;  %v2001_v28 = vpop.f32.mrf.mxu1  ;;  %v2021_v29 = vsel %vm1381_vm4, %v2013_v26, -inf }
 0x51a   : > { %v2010_v32 = vmul.f32 0.35355338, %v2001_v28  ;;  %2022 = vmax.xlane.f32.xlu0 %v2021_v29  ;;  %v475_v27 = vld [vmem:[%s3381_s25 + $0xc] sm:$0xf] }
 0x51b   : > { %v3077_v51 = vpop.f32.mrf.mxu0  ;;  %v3082_v4 = vpop.f32.mrf.mxu1 }
 0x51c   : > { %v2014_v9 = vsel %vm3750_vm6, %v2010_v32, -1e+30  ;;  %v2404_v51 = vsel %vm1625_vm5, %v475_v27, 0 }
 0x51d   : > { %v2004_v34 = vpop.f32.mrf.mxu1  ;;  %v2024_v35 = vsel %vm1381_vm4, %v2014_v9, -inf }
 0x51e   : > { %2025 = vmax.xlane.f32.xlu1 %v2024_v35 }
 0x51f   : > { %v3083_v36 = vpop.f32.mrf.mxu1 }
 0x59b   : > { %v2017_v37 = vpop.xlane.xlu0 %2016 }
 0x59c   : > { %v2027_v39 = vsub.f32 %v2011_v13, %v2017_v37 }
 0x59e   : > { %v2031_v40 = vmul.f32 1.442695, %v2027_v39 }
 0x59f   : > { %v2020_v8 = vpop.xlane.xlu1 %2019 }
 0x5a0   : > { %3225 = vpow2.f32 %v2031_v40  ;;  %v2028_v41 = vsub.f32 %v2012_v5, %v2020_v8 }
 0x5a2   : > { %v2033_v48 = vmul.f32 1.442695, %v2028_v41 }
 0x5a3   : > { %v2023_v33 = vpop.xlane.xlu0 %2022 }
 0x5a4   : > { %3227 = vpow2.f32 %v2033_v48  ;;  %v2029_v52 = vsub.f32 %v2013_v26, %v2023_v33 }
 0x5a6   : > { %v2035_v58 = vmul.f32 1.442695, %v2029_v52 }
 0x5a7   : > { %v2026_v42 = vpop.xlane.xlu1 %2025 }
 0x5a8   : > { %3229 = vpow2.f32 %v2035_v58  ;;  %v2030_v22 = vsub.f32 %v2014_v9, %v2026_v42 }
 0x5aa   : > { %v2037_v47 = vmul.f32 1.442695, %v2030_v22 }
 0x5ac   : > { %3231 = vpow2.f32 %v2037_v47 }
 0x5ad   : > { %v3226_v2 = vpop.eup %3225 }
 0x5ae   : > { %v2039_v45 = vsel %vm1381_vm4, %v3226_v2, 0.0 }
 0x5af   : > { %2040 = vadd.xlane.f32.xlu0 %v2039_v45 }
 0x5b1   : > { %v3228_v38 = vpop.eup %3227 }
 0x5b2   : > { %v2042_v30 = vsel %vm1381_vm4, %v3228_v38, 0.0 }
 0x5b3   : > { %2043 = vadd.xlane.f32.xlu1 %v2042_v30 }
 0x5b5   : > { %v3230_v53 = vpop.eup %3229 }
 0x5b6   : > { %v2045_v46 = vsel %vm1381_vm4, %v3230_v53, 0.0 }
 0x5b7   : > { %2046 = vadd.xlane.f32.xlu0 %v2045_v46 }
 0x5b9   : > { %v3232_v49 = vpop.eup %3231 }
 0x5ba   : > { %v2048_v14 = vsel %vm1381_vm4, %v3232_v49, 0.0 }
 0x5bb   : > { %2049 = vadd.xlane.f32.xlu1 %v2048_v14 }
 0x638   : > { %v2041_v57 = vpop.xlane.xlu0 %2040 }
 0x639   : > { %3233 = vrcp.f32 %v2041_v57 }
 0x63c   : > { %v2044_v19 = vpop.xlane.xlu1 %2043 }
 0x63d   : > { %3235 = vrcp.f32 %v2044_v19 }
 0x640   : > { %v2047_v54 = vpop.xlane.xlu0 %2046 }
 0x641   : > { %3237 = vrcp.f32 %v2047_v54 }
 0x644   : > { %v2050_v59 = vpop.xlane.xlu1 %2049 }
 0x645   : > { %3239 = vrcp.f32 %v2050_v59 }
 0x646   : > { %v3234_v60 = vpop.eup %3233 }
 0x647   : > { %v2055_v56 = vmul.f32 %v3234_v60, %v3226_v2 }
 0x649   : > { %v2059_v15 = vpack.c.bf16 %v2055_v56, %v2055_v56 }
 0x64a   : > { %v3236_v20 = vpop.eup %3235 }
 0x64b   : > { %3087 = vmatmul.mubr.msk.bf16.vlgmr.msra.gmra.mxu0 %vm1381_vm4, %v2059_v15  ;;  %v2056_v12 = vmul.f32 %v3236_v20, %v3228_v38 }
 0x64c   : > { %3097 = vmatpush3.bf16.msra.mxu0 %v2165_v11  ;;  %3098 = vmatprep.mubr.msk.bf16.mxu0 %vm3292_vm2, %v3291_v10 }
 0x64d   : > { %v2060_v13 = vpack.c.bf16 %v2056_v12, %v2056_v12  ;;  %3108 = vmatprep.subr.bf16.mxu0 %v3291_v10  ;;  %v3253_v12 = vld [vmem:[#allocation2] sm:$0xff] }
 0x64e   : > { %v3238_v16 = vpop.eup %3237 }
 0x64f   : > { %3093 = vmatmul.mubr.msk.bf16.vlgmr.msra.gmra.mxu1 %vm1381_vm4, %v2060_v13  ;;  %v2057_v44 = vmul.f32 %v3238_v16, %v3230_v53 }
 0x650   : > { %3103 = vmatpush3.bf16.msra.mxu1 %v2213_v43  ;;  %3104 = vmatprep.mubr.msk.bf16.mxu1 %vm3292_vm2, %v3291_v10 }
 0x651   : > { %v2061_v17 = vpack.c.bf16 %v2057_v44, %v2057_v44  ;;  %3114 = vmatprep.subr.bf16.mxu1 %v3291_v10 }
 0x652   : > { %v3240_v63 = vpop.eup %3239 }
 0x653   : > { %3099 = vmatmul.mubr.msk.bf16.vlgmr.msra.gmra.mxu0 %vm1381_vm4, %v2061_v17  ;;  %v2058_v1 = vmul.f32 %v3240_v63, %v3232_v49 }
 0x654   : > { %3109 = vmatpush3.bf16.msra.mxu0 %v2263_v18  ;;  %3110 = vmatprep.mubr.msk.bf16.mxu0 %vm3292_vm2, %v3291_v10  ;;  %v3254_v18 = vld [vmem:[#allocation2 + $0x8] sm:$0xff] }
 0x655   : > { %v2062_v5 = vpack.c.bf16 %v2058_v1, %v2058_v1  ;;  %3120 = vmatprep.subr.bf16.mxu0 %v3291_v10 }
 0x657   : > { %3105 = vmatmul.mubr.msk.bf16.vlgmr.msra.gmra.mxu1 %vm1381_vm4, %v2062_v5 }
 0x658   : > { %3116 = vmatprep.mubr.msk.bf16.mxu1 %vm3292_vm2, %v3291_v10  ;;  %3115 = vmatpush3.bf16.msra.mxu1 %v2310_v21  ;;  %v3199_v21 = vld [vmem:[%s3386_s28 + $0x8] sm:$0xff]  }
 0x659   : > { %3126 = vmatprep.subr.bf16.mxu1 %v3291_v10 }
 0x70b   : > { %v2105_v24 = vpop.f32.mrf.mxu0 }
 0x70c   : > { %v2255_v25 = vpack.c.bf16 %v2105_v24, %v3822_v31 }
 0x70d   : > { %v3088_v26 = vpop.f32.mrf.mxu0 }
 0x70e   : > { %3111 = vmatmul.mubr.msk.bf16.vlgmr.msra.gmra.mxu0 %vm1381_vm4, %v2255_v25 }
 0x70f   : > { %v2108_v28 = vpop.f32.mrf.mxu0  ;;  %v2153_v29 = vpop.f32.mrf.mxu1  ;;  %3121 = vmatpush3.bf16.msra.mxu0 %v2357_v3  ;;  %3122 = vmatprep.mubr.msk.bf16.mxu0 %vm3292_vm2, %v3291_v10 }
 0x710   : > { %v2256_v32 = vpack.c.bf16 %v2153_v29, %v3824_v50  ;;  %3132 = vmatprep.subr.bf16.mxu0 %v3291_v10 }
 0x711   : > { %v3089_v4 = vpop.f32.mrf.mxu0  ;;  %v3094_v31 = vpop.f32.mrf.mxu1 }
 0x712   : > { %3117 = vmatmul.mubr.msk.bf16.vlgmr.msra.gmra.mxu1 %vm1381_vm4, %v2256_v32  ;;  %v2814_v4 = vld [vmem:[%s396_s19] ss:$0 sm:$0xff]  ;;  %s3296_s19 = smov [#allocation2]  }
 0x713   : > { %v2156_v9 = vpop.f32.mrf.mxu1  ;;  %v2201_v34 = vpop.f32.mrf.mxu0  ;;  %3127 = vmatpush3.bf16.msra.mxu1 %v2404_v51  ;;  %3128 = vmatprep.mubr.msk.bf16.mxu1 %vm3292_vm2, %v3291_v10 }
 0x714   : > { %v2257_v35 = vpack.c.bf16 %v2201_v34, %v3826_v55  ;;  %3140 = vmatprep.subr.bf16.mxu1 %v3291_v10 }
 0x715   : > { %v3095_v36 = vpop.f32.mrf.mxu1  ;;  %v3100_v50 = vpop.f32.mrf.mxu0 }
 0x716   : > { %3123 = vmatmul.mubr.msk.bf16.vlgmr.msra.gmra.mxu0 %vm1381_vm4, %v2257_v35  ;;  %v3201_v36 = vld [vmem:[%s3392_s17 + $0x18] sm:$0xff]   ;;  %v3202_v50 = vld [vmem:[%s3392_s17 + $0x10] sm:$0xff]  }
 0x717   : > { %v2204_v37 = vpop.f32.mrf.mxu0  ;;  %v2249_v39 = vpop.f32.mrf.mxu1  ;;  %3136 = vmatprep.mubr.msk.bf16.mxu0 %vm3292_vm2, %v3291_v10  ;;  %3133 = vmatpush3.bf16.msra.mxu0 %v3199_v21 }
 0x718   : > { %v2258_v40 = vpack.c.bf16 %v2249_v39, %v3828_v61  ;;  %3134 = vmatprep.subr.bf16.mxu0 %v3291_v10  ;;  %v3203_v37 = vld [vmem:[%s3392_s17 + $0x8] sm:$0xff]   ;;  %v3204_v39 = vld [vmem:[%s3392_s17] sm:$0xff]   ;;  %s2649_s17 = sshll.u32 %s3296_s19, 4  ;;  %s2650_s17 = int_to_ptr.vmem [resolvable:$true] %s2649_s17 }
 0x719   : > { %v3101_v8 = vpop.f32.mrf.mxu0  ;;  %v3106_v41 = vpop.f32.mrf.mxu1  ;;  %s3255_s20 = scalar_lea.vmem %s2650_s17, 256  ;;  %p3262_p9 = scmp.lt.s32.totalorder %s2650_s17, %s2650_s17 }
 0x71a   : > { %3129 = vmatmul.mubr.msk.bf16.vlgmr.msra.gmra.mxu1 %vm1381_vm4, %v2258_v40  ;;  %p3256_p6 = scmp.ne.s32.totalorder %s2650_s17, %s3255_s20  ;;  %p3263_p10 = scmp.lt.s32.totalorder %s3255_s20, %s3255_s20 }
 0x71b   : > { %v2252_v48 = vpop.f32.mrf.mxu1  ;;  %3148 = vmatprep.mubr.msk.bf16.mxu1 %vm3292_vm2, %v3291_v10  ;;  %3135 = vmatpush3.bf16.msra.mxu0 %v3200_v23 }
 0x71c   : > { %3141 = vmatpush3.bf16.msra.mxu1 %v3201_v36  ;;  %p3257_p7 = pnand %p3256_p6, %p3157_p5  ;;  %p3264_p11 = por %p3263_p10, %p3262_p9 }
 0x71d   : > { %v3107_v55 = vpop.f32.mrf.mxu1  ;;  %3142 = vmatprep.subr.bf16.mxu1 %v3291_v10 }
 0x71e   : > { %p3258_p8 = pneg %p3257_p7 }
 0x720   : > { %3143 = vmatpush3.bf16.msra.mxu1 %v3202_v50  ;;  %p3265_p12 = pnand %p3264_p11, %p3258_p8 }
 0x721   : > { %3144 = vmatprep.subr.bf16.mxu1 %v3291_v10 }
 0x724   : > { %3145 = vmatpush3.bf16.msra.mxu1 %v3203_v37 }
 0x725   : > { %3146 = vmatprep.subr.bf16.mxu1 %v3291_v10 }
 0x728   : > { %3147 = vmatpush3.bf16.msra.mxu1 %v3204_v39 }
 0x7ce   : > { %v2299_v33 = vpop.f32.mrf.mxu0 }
 0x7cf   : > { %v2447_v61 = vsel %vm491_vm1, %v2299_v33, 0.0 }
 0x7d0   : > { %v3112_v52 = vpop.f32.mrf.mxu0 }
 0x7d2   : > { %v2302_v58 = vpop.f32.mrf.mxu0  ;;  %v2346_v42 = vpop.f32.mrf.mxu1 }
 0x7d3   : > { %v2448_v2 = vsel %vm491_vm1, %v2346_v42, 0.0  ;;  %v2454_v59 = vsel %vm491_vm1, %v2302_v58, 0.0 }
 0x7d4   : > { %v3113_v22 = vpop.f32.mrf.mxu0  ;;  %v3118_v47 = vpop.f32.mrf.mxu1  ;;  %v2449_v53 = vadd.f32 %v2448_v2, %v2447_v61 }
 0x7d6   : > { %v2349_v45 = vpop.f32.mrf.mxu1  ;;  %v2393_v38 = vpop.f32.mrf.mxu0 }
 0x7d7   : > { %v2450_v30 = vsel %vm491_vm1, %v2393_v38, 0.0  ;;  %v2455_v14 = vsel %vm491_vm1, %v2349_v45, 0.0 }
 0x7d8   : > { %v3119_v46 = vpop.f32.mrf.mxu1  ;;  %v3124_v49 = vpop.f32.mrf.mxu0  ;;  %v2451_v57 = vadd.f32 %v2450_v30, %v2449_v53  ;;  %v2456_v56 = vadd.f32 %v2455_v14, %v2454_v59 }
 0x7da   : > { %v2396_v19 = vpop.f32.mrf.mxu0  ;;  %v2440_v54 = vpop.f32.mrf.mxu1 }
 0x7db   : > { %v2457_v60 = vsel %vm491_vm1, %v2396_v19, 0.0  ;;  %v2452_v0 = vsel %vm491_vm1, %v2440_v54, 0.0 }
 0x7dc   : > { %v2453_v15 = vadd.f32 %v2452_v0, %v2451_v57  ;;  %v3125_v20 = vpop.f32.mrf.mxu0  ;;  %v3130_v62 = vpop.f32.mrf.mxu1  ;;  %v2458_v11 = vadd.f32 %v2457_v60, %v2456_v56 }
 0x7de   : > { %v3899_v13 = vadd.f32 %v3253_v12, %v2453_v15  ;;  %v2443_v16 = vpop.f32.mrf.mxu1 }
 0x7df   : > { %v2459_v7 = vsel %vm491_vm1, %v2443_v16, 0.0 }
 0x7e0   : > { %v2460_v43 = vadd.f32 %v2459_v7, %v2458_v11  ;;  %v3131_v44 = vpop.f32.mrf.mxu1  ;;  %v2463_v17 = vmul.f32 %v3899_v13, %v3899_v13 }
 0x7e2   : > { %v3904_v63 = vadd.f32 %v3254_v18, %v2460_v43  ;;  %v2465_v1 = vsel %vm491_vm1, %v2463_v17, 0.0 }
 0x7e3   : > { %2466 = vadd.xlane.f32.xlu0 %v2465_v1 }
 0x7e4   : > { %v2464_v5 = vmul.f32 %v3904_v63, %v3904_v63 }
 0x7e6   : > { %v2468_v6 = vsel %vm491_vm1, %v2464_v5, 0.0 }
 0x7e7   : > { %2469 = vadd.xlane.f32.xlu1 %v2468_v6 }
 0x86c   : > { %v2467_v24 = vpop.xlane.xlu0 %2466 }
 0x86d   : > { %v2471_v25 = vmul.f32 0.03125, %v2467_v24 }
 0x86f   : > { %v2473_v3 = vadd.f32 1e-06, %v2471_v25 }
 0x870   : > { %v2470_v26 = vpop.xlane.xlu1 %2469 }
 0x871   : > { %3241 = vrsqrt.f32 %v2473_v3  ;;  %v2472_v27 = vmul.f32 0.03125, %v2470_v26 }
 0x873   : > { %v2474_v28 = vadd.f32 1e-06, %v2472_v27 }
 0x875   : > { %3243 = vrsqrt.f32 %v2474_v28 }
 0x87e   : > { %v3242_v29 = vpop.eup %3241 }
 0x87f   : > { %v2477_v32 = vmul.f32 %v3242_v29, %v3899_v13 }
 0x881   : > { %v2485_v9 = vmul.f32 %v2814_v4, %v2477_v32 }
 0x882   : > { %v3244_v51 = vpop.eup %3243 }
 0x883   : > { %v2478_v31 = vmul.f32 %v3244_v51, %v3904_v63 }
 0x885   : > { %v2486_v34 = vmul.f32 %v2814_v4, %v2478_v31 }
 0x887   : > { %v2487_v35 = vpack.c.bf16 %v2486_v34, %v2485_v9 }
 0x889   : > { %3137 = vmatmul.mubr.msk.bf16.vlgmr.msra.gmra.mxu0 %vm491_vm1, %v2487_v35 }
 0x949   : > { %v2537_v40 = vpop.f32.mrf.mxu0 }
 0x94a   : > { %2560 = vrot.lane.b32.xlu0 %v2537_v40, %s3295_s11  ;;  %v2818_v55 = vmul.f32 -1.442695, %v2537_v40 }
 0x94b   : > { %v3138_v8 = vpop.f32.mrf.mxu0 }
 0x94c   : > { %3245 = vpow2.f32 %v2818_v55 }
 0x94d   : > { %v2540_v41 = vpop.f32.mrf.mxu0 }
 0x94e   : > { %2562 = vrot.lane.b32.xlu1 %v2540_v41, %s3295_s11  ;;  %v2819_v33 = vmul.f32 -1.442695, %v2540_v41 }
 0x94f   : > { %v3139_v48 = vpop.f32.mrf.mxu0 }
 0x950   : > { %3247 = vpow2.f32 %v2819_v33 }
 0x959   : > { %v3246_v52 = vpop.eup %3245 }
 0x95a   : > { %v2550_v42 = vadd.f32 1.0, %v3246_v52 }
 0x95c   : > { %3249 = vrcp.f32 %v2550_v42 }
 0x95d   : > { %v3248_v58 = vpop.eup %3247 }
 0x95e   : > { %v2551_v22 = vadd.f32 1.0, %v3248_v58 }
 0x960   : > { %3251 = vrcp.f32 %v2551_v22 }
 0x969   : > { %v3250_v10 = vpop.eup %3249 }
 0x96a   : > { %v2556_v45 = vmul.f32 %v3250_v10, %v2537_v40 }
 0x96d   : > { %v3252_v47 = vpop.eup %3251 }
 0x96e   : > { %v2557_v38 = vmul.f32 %v3252_v47, %v2540_v41 }
 0x9bc   : > { %v2561_v2 = vpop.permute.xlu0 %2560 }
 0x9bd   : > { %v2566_v30 = vmul.f32 %v2561_v2, %v2556_v45 }
 0x9c0   : > { %v2563_v61 = vpop.permute.xlu1 %2562 }
 0x9c1   : > { %v2567_v53 = vmul.f32 %v2563_v61, %v2557_v38 }
 0x9c3   : > { %v2568_v46 = vpack.c.bf16 %v2567_v53, %v2566_v30 }
 0x9c5   : > { %3149 = vmatmul.mubr.msk.bf16.vlgmr.msra.gmra.mxu1 %vm2593_vm7, %v2568_v46 }
 0xa85   : > { %v2631_v49 = vpop.f32.mrf.mxu1 }
 0xa86   : > { %v2638_v14 = vadd.f32 %v2631_v49, %v3899_v13 }
 0xa87   : > { %v3150_v57 = vpop.f32.mrf.mxu1 }
 0xa88   : > { %2640 = vst.msk [vmem:[#allocation2] sm:$0xff] %vm491_vm1, %v2638_v14 }
 0xa89   : > { %v2634_v19 = vpop.f32.mrf.mxu1 }
 0xa8a   : > { %v2639_v54 = vadd.f32 %v2634_v19, %v3904_v63 }
 0xa8b   : > { %v3151_v59 = vpop.f32.mrf.mxu1 }
 0xa8c   : > { %2642 = vst.msk [vmem:[#allocation2 + $0x8] sm:$0xff] %vm491_vm1, %v2639_v54 }
 0xa8d   : > { %3268 = shalt.err (!%p3265_p12)
}
 0xa8e   : > { %s3297_s21 = smov 128   ;;  %s3298_s16 = smov 8  }
 0xa8f   : > { %3154 = dma.vmem_to_hbm [thread:$0]  (%p3157_p5), %s2650_s17, 256, %s3956_s9, [#allocation3], %s3297_s21, %s3297_s21, %s3298_s16  }
 0xa90   : > { %3284 = dma.done.wait (%p3157_p5), [#allocation3], 256  }
 0xa91   : > { %3286 = vsyncadd (%p3157_p5), [#allocation3], 4294967040 }
 0xa92 PF: > { %s20_s30 = sadd.s32 1, %s3289_s30  }
 0xa93   : > { %p17_p13 = scmp.ge.s32.totalorder %s20_s30, 4  }
 0xa95   :  { %19 = sbr.rel (!%p17_p13) target bundleno = 1 (0x1), region = 103 }
 0xa9a   :  { %2665 = vsyncpa [#allocation3], 1 }
 0xa9b   :  { %2667 = vsyncpa [#allocation3 + $0x1], 1 }

</bundles_post_ra>
